<compile_context>
chip_gen: v6e
topology: v6e:2x2x1
jax: 0.10.0
libtpu: 0.0.40
codegen_flags: <defaults>
</compile_context>

<pallas_src>
import functools

import jax
import jax.numpy as jnp
from jax import lax
from jax.experimental import pallas as pl
from jax.experimental.pallas import tpu as pltpu

LANE = 128          # lane width / persistent channel padding
TM_MAX = 1024       # row tile (bf16 inputs -> ~4.5 MiB double-buffered VMEM)
BN_EPS = 1e-5
LEAKY = 0.1

CONFIG2 = [(32, 3, 1), (64, 3, 2), ['B', 1], (128, 3, 2), ['B', 2], (256, 3, 2),
           ['B', 8], (512, 3, 2), ['B', 8], (1024, 3, 2), ['B', 4], (512, 1, 1),
           (1024, 3, 1), 'S', (256, 1, 1), 'U', (256, 1, 1), (512, 3, 1), 'S',
           (128, 1, 1), 'U', (128, 1, 1), (256, 3, 1), 'S']


def _round_up(x, m):
    return (x + m - 1) // m * m


# ----------------------------------------------------------------------------
# Pallas kernel 1: tiled im2col matmul (conv) with optional bias and fused
# per-tile channel sum / sum-of-squares emission (for BatchNorm statistics).
# grid = (M_tiles, Cout_tiles, K_tiles); K is the reduction ("arbitrary") axis.
# ----------------------------------------------------------------------------
def _conv_mm_kernel(*refs, with_bias):
    if with_bias:
        x_ref, w_ref, b_ref, o_ref, s1_ref, s2_ref, acc_ref = refs
    else:
        x_ref, w_ref, o_ref, s1_ref, s2_ref, acc_ref = refs
        b_ref = None

    @pl.when(pl.program_id(2) == 0)
    def _():
        acc_ref[...] = jnp.zeros_like(acc_ref)

    acc_ref[...] += jnp.dot(x_ref[...], w_ref[...],
                            preferred_element_type=jnp.float32)

    @pl.when(pl.program_id(2) == pl.num_programs(2) - 1)
    def _():
        acc = acc_ref[...]
        # Per-(M-tile, C-tile) partial stats from the f32 accumulator.
        s1_ref[...] = jnp.sum(acc, axis=0, keepdims=True)[None]         # (1,1,TN)
        s2_ref[...] = jnp.sum(acc * acc, axis=0, keepdims=True)[None]   # (1,1,TN)
        if with_bias:
            acc = acc + b_ref[...]
        o_ref[...] = acc.astype(o_ref.dtype)


def conv_matmul(patches, w_mat, bias, out_dtype):
    """patches: (M, K) bf16, w_mat: (Kp, Cp) bf16, bias: (Cp,) f32 or None.

    Returns (y (Mp, Cp) out_dtype, sum (gm,1,Cp) f32, sumsq (gm,1,Cp) f32).
    """
    M, K = patches.shape
    Kp, Cp = w_mat.shape
    if K < Kp:                                   # only layer 0 (Cin=3 -> K=27)
        patches = jnp.pad(patches, ((0, 0), (0, Kp - K)))

    TM = min(TM_MAX, _round_up(M, 16))
    Mp = _round_up(M, TM)
    if Mp > M:
        patches = jnp.pad(patches, ((0, Mp - M), (0, 0)))
    TN = 256 if Cp % 256 == 0 else 128
    TK = 256 if Kp % 256 == 0 else 128
    gm, gn, gk = Mp // TM, Cp // TN, Kp // TK
    with_bias = bias is not None

    in_specs = [
        pl.BlockSpec((TM, TK), lambda m, n, k: (m, k)),
        pl.BlockSpec((TK, TN), lambda m, n, k: (k, n)),
    ]
    inputs = [patches, w_mat]
    if with_bias:
        in_specs.append(pl.BlockSpec((1, TN), lambda m, n, k: (0, n)))
        inputs.append(bias.reshape(1, Cp))

    out_bytes = jnp.dtype(out_dtype).itemsize
    cost = pl.CostEstimate(
        flops=2 * Mp * Kp * Cp,
        transcendentals=0,
        bytes_accessed=(Mp * Kp * 2 + Kp * Cp * 2 + Mp * Cp * out_bytes
                        + 2 * gm * Cp * 4))

    y, ssum, ssq = pl.pallas_call(
        functools.partial(_conv_mm_kernel, with_bias=with_bias),
        out_shape=(jax.ShapeDtypeStruct((Mp, Cp), out_dtype),
                   jax.ShapeDtypeStruct((gm, 1, Cp), jnp.float32),
                   jax.ShapeDtypeStruct((gm, 1, Cp), jnp.float32)),
        grid_spec=pltpu.PrefetchScalarGridSpec(
            num_scalar_prefetch=0,
            grid=(gm, gn, gk),
            in_specs=in_specs,
            out_specs=(pl.BlockSpec((TM, TN), lambda m, n, k: (m, n)),
                       pl.BlockSpec((1, 1, TN), lambda m, n, k: (m, 0, n)),
                       pl.BlockSpec((1, 1, TN), lambda m, n, k: (m, 0, n))),
            scratch_shapes=[pltpu.VMEM((TM, TN), jnp.float32)]),
        compiler_params=pltpu.CompilerParams(
            dimension_semantics=("parallel", "parallel", "arbitrary")),
        cost_estimate=cost,
    )(*inputs)
    return y, ssum, ssq


# ----------------------------------------------------------------------------
# Pallas kernel 2: fused BatchNorm-apply + LeakyReLU(0.1) (+ optional residual)
# Elementwise, tiled over (M, C); both grid axes "parallel".
# ----------------------------------------------------------------------------
def _bn_act_kernel(*refs, with_residual):
    if with_residual:
        y_ref, s_ref, t_ref, r_ref, o_ref = refs
    else:
        y_ref, s_ref, t_ref, o_ref = refs
        r_ref = None
    z = y_ref[...].astype(jnp.float32) * s_ref[...] + t_ref[...]
    z = jnp.where(z > 0, z, LEAKY * z)
    if with_residual:
        z = z + r_ref[...].astype(jnp.float32)
    o_ref[...] = z.astype(o_ref.dtype)


def bn_leaky_apply(y, scale, shift, residual=None):
    """y: (Mp, Cp), scale/shift: (Cp,) f32, residual: (Mp, Cp) or None."""
    Mp, Cp = y.shape
    TMA = min(TM_MAX, Mp)
    TNA = 128
    gm, gc = Mp // TMA, Cp // TNA

    in_specs = [
        pl.BlockSpec((TMA, TNA), lambda m, c: (m, c)),
        pl.BlockSpec((1, TNA), lambda m, c: (0, c)),
        pl.BlockSpec((1, TNA), lambda m, c: (0, c)),
    ]
    inputs = [y, scale.reshape(1, Cp), shift.reshape(1, Cp)]
    if residual is not None:
        in_specs.append(pl.BlockSpec((TMA, TNA), lambda m, c: (m, c)))
        inputs.append(residual)

    return pl.pallas_call(
        functools.partial(_bn_act_kernel, with_residual=residual is not None),
        out_shape=jax.ShapeDtypeStruct((Mp, Cp), jnp.bfloat16),
        grid=(gm, gc),
        in_specs=in_specs,
        out_specs=pl.BlockSpec((TMA, TNA), lambda m, c: (m, c)),
        compiler_params=pltpu.CompilerParams(
            dimension_semantics=("parallel", "parallel")),
    )(*inputs)


# ----------------------------------------------------------------------------
# JAX glue: im2col patch extraction and block application.
# ----------------------------------------------------------------------------
def im2col(x, ksize, stride, padding):
    """x: (N, H, W, C) bf16 -> (N*Ho*Wo, k*k*C), Ho, Wo."""
    N, H, W, C = x.shape
    if ksize == 1 and stride == 1 and padding == 0:
        return x.reshape(N * H * W, C), H, W
    xp = jnp.pad(x, ((0, 0), (padding, padding), (padding, padding), (0, 0)))
    Ho = (H + 2 * padding - ksize) // stride + 1
    Wo = (W + 2 * padding - ksize) // stride + 1
    cols = []
    for kh in range(ksize):
        for kw in range(ksize):
            sl = xp[:, kh:kh + stride * (Ho - 1) + 1:stride,
                    kw:kw + stride * (Wo - 1) + 1:stride, :]
            cols.append(sl)
    patches = jnp.stack(cols, axis=3)                     # (N, Ho, Wo, k*k, C)
    return patches.reshape(N * Ho * Wo, ksize * ksize * C), Ho, Wo


def cnn_block(x, params, ksize, stride, padding, bn_act=True, residual=None):
    """CNNBlock: Conv2d (+bias if not bn_act) [+ BatchNorm + LeakyReLU(0.1)].

    `residual` (same shape as the output) is fused into the BN/leaky kernel
    (matches `x = x + block(x)` in ResidualBlock).
    """
    N = x.shape[0]
    patches, Ho, Wo = im2col(x, ksize, stride, padding)
    M = N * Ho * Wo
    w_mat = params['w']
    Cp = w_mat.shape[1]
    out_dtype = jnp.bfloat16 if bn_act else jnp.float32
    bias = params.get('b')

    y, ssum, ssq = conv_matmul(patches, w_mat, bias, out_dtype)   # (Mp, Cp)
    Mp = y.shape[0]

    if bn_act:
        # Training-mode batch statistics (nn.BatchNorm2d default), one-pass
        # E[y^2] - mean^2 from the in-kernel partial sums (true M, padded rows
        # are zero and contribute nothing).
        total = jnp.sum(ssum, axis=(0, 1))                 # (Cp,)
        total_sq = jnp.sum(ssq, axis=(0, 1))               # (Cp,)
        mean = total / M
        var = jnp.maximum(total_sq / M - mean * mean, 0.0)
        scale = params['gamma'] * lax.rsqrt(var + BN_EPS)
        shift = params['beta'] - mean * scale

        res_flat = None
        if residual is not None:
            res_flat = residual.reshape(M, Cp)
            if Mp > M:
                res_flat = jnp.pad(res_flat, ((0, Mp - M), (0, 0)))
        y = bn_leaky_apply(y, scale, shift, res_flat)

    if Mp > M:
        y = y[:M]
    return y.reshape(N, Ho, Wo, Cp)


# ----------------------------------------------------------------------------
# Parameter construction (deterministic, mirrors _create_conv_layers).
# Weights stored flattened, channel-padded to lane multiples, bf16.
# ----------------------------------------------------------------------------
def init_conv(key, cin, cout, k, bn_act=True, pad_in=True):
    kw, kb, kg, kbt = jax.random.split(key, 4)
    cin_p = _round_up(cin, LANE) if pad_in else cin
    cout_p = _round_up(cout, LANE)
    std = (2.0 / (cin * k * k)) ** 0.5
    w = std * jax.random.normal(kw, (k, k, cin, cout), jnp.float32)
    w = jnp.pad(w, ((0, 0), (0, 0), (0, cin_p - cin), (0, cout_p - cout)))
    w = w.reshape(k * k * cin_p, cout_p)
    kp = _round_up(w.shape[0], LANE)
    if kp > w.shape[0]:
        w = jnp.pad(w, ((0, kp - w.shape[0]), (0, 0)))
    p = {'w': w.astype(jnp.bfloat16)}
    if bn_act:
        p['gamma'] = jnp.pad(
            1.0 + 0.1 * jax.random.normal(kg, (cout,), jnp.float32),
            (0, cout_p - cout))
        p['beta'] = jnp.pad(
            0.1 * jax.random.normal(kbt, (cout,), jnp.float32),
            (0, cout_p - cout))
    else:
        p['b'] = jnp.pad(
            0.1 * jax.random.normal(kb, (cout,), jnp.float32),
            (0, cout_p - cout))
    return p


def build_yolov3_params(key, in_channels, num_classes):
    layers = []
    c = in_channels
    keys = list(jax.random.split(key, 512))
    it = iter(keys)
    nk = lambda: next(it)
    first = True
    for module in CONFIG2:
        if isinstance(module, tuple):
            cout, k, s = module
            layers.append(dict(type='cnn',
                               p=init_conv(nk(), c, cout, k, pad_in=not first),
                               k=k, s=s, pad=1 if k == 3 else 0))
            c = cout
            first = False
        elif isinstance(module, list):
            nrep = module[1]
            reps = [(init_conv(nk(), c, c // 2, 1),
                     init_conv(nk(), c // 2, c, 3)) for _ in range(nrep)]
            layers.append(dict(type='res', reps=reps, use_residual=True,
                               num_repeats=nrep))
        elif module == 'S':
            layers.append(dict(type='res',
                               reps=[(init_conv(nk(), c, c // 2, 1),
                                      init_conv(nk(), c // 2, c, 3))],
                               use_residual=False, num_repeats=1))
            layers.append(dict(type='cnn', p=init_conv(nk(), c, c // 2, 1),
                               k=1, s=1, pad=0))
            c2 = c // 2
            layers.append(dict(type='scale',
                               p1=init_conv(nk(), c2, 2 * c2, 3),
                               p2=init_conv(nk(), 2 * c2,
                                            3 * (num_classes + 5), 1,
                                            bn_act=False),
                               num_classes=num_classes))
            c = c2
        elif module == 'U':
            layers.append(dict(type='up'))
            c = c * 3
    return layers


# ----------------------------------------------------------------------------
# Forward pass (mirrors YOLOv3.forward).
# ----------------------------------------------------------------------------
def yolov3_forward(layers, x_nchw):
    # NCHW -> NHWC bf16; channels become lane-padded after the first conv.
    x = jnp.transpose(x_nchw, (0, 2, 3, 1)).astype(jnp.bfloat16)
    outputs = []
    routes = []
    for layer in layers:
        t = layer['type']
        if t == 'scale':
            nc = layer['num_classes']
            y = cnn_block(x, layer['p1'], 3, 1, 1, bn_act=True)
            y = cnn_block(y, layer['p2'], 1, 1, 0, bn_act=False)
            y = y[..., :3 * (nc + 5)].astype(jnp.float32)
            N, H, W, _ = y.shape
            # matches .reshape(N, 3, nc+5, H, W).permute(0, 1, 3, 4, 2) in NCHW
            y = y.reshape(N, H, W, 3, nc + 5)
            outputs.append(jnp.transpose(y, (0, 3, 1, 2, 4)))   # (N,3,H,W,nc+5)
            continue
        if t == 'cnn':
            x = cnn_block(x, layer['p'], layer['k'], layer['s'], layer['pad'],
                          bn_act=True)
        elif t == 'res':
            for p1, p2 in layer['reps']:
                y = cnn_block(x, p1, 1, 1, 0, bn_act=True)
                x = cnn_block(y, p2, 3, 1, 1, bn_act=True,
                              residual=x if layer['use_residual'] else None)
            if layer['num_repeats'] == 8:
                routes.append(x)
        elif t == 'up':
            # nn.Upsample(scale_factor=2), mode='nearest' (pure data movement)
            x = jnp.repeat(jnp.repeat(x, 2, axis=1), 2, axis=2)
            x = jnp.concatenate([x, routes[-1]], axis=-1)       # dim=1 in NCHW
            routes.pop()
    return outputs


# ----------------------------------------------------------------------------
if __name__ == "__main__":
    key = jax.random.PRNGKey(0)
    k_param, k_inp = jax.random.split(key)

    batch, in_channels, spatial, num_classes = 2, 3, 32, 4
    x = jax.random.normal(k_inp, (batch, in_channels, spatial, spatial),
                          jnp.float32)

    layers = build_yolov3_params(k_param, in_channels, num_classes)
    outs = yolov3_forward(layers, x)
    outs = [jax.block_until_ready(o) for o in outs]

    expected = [(batch, 3, spatial // 32, spatial // 32, num_classes + 5),
                (batch, 3, spatial // 16, spatial // 16, num_classes + 5),
                (batch, 3, spatial // 8, spatial // 8, num_classes + 5)]
    assert [o.shape for o in outs] == expected, [o.shape for o in outs]
    assert all(bool(jnp.all(jnp.isfinite(o))) for o in outs)

    print("KERNEL_OK")
</pallas_src>

<mosaic_0001>
module attributes {stable_mosaic.version = 11 : i64} {
  func.func @_conv_mm_kernel(%arg0: i32, %arg1: i32, %arg2: i32, %arg3: memref<1024x128xbf16, #tpu.memory_space<vmem>>, %arg4: memref<128x128xbf16, #tpu.memory_space<vmem>>, %arg5: memref<1024x128xbf16, #tpu.memory_space<vmem>>, %arg6: memref<1x1x128xf32, #tpu.memory_space<vmem>>, %arg7: memref<1x1x128xf32, #tpu.memory_space<vmem>>, %arg8: memref<1024x128xf32, #tpu.memory_space<vmem>>) attributes {dimension_semantics = [#tpu.dimension_semantics<parallel>, #tpu.dimension_semantics<parallel>, #tpu.dimension_semantics<arbitrary>], iteration_bounds = array<i64: 2, 1, 1>, scalar_prefetch = 0 : i64, scratch_operands = 1 : i64, tpu.core_type = #tpu.core_type<tc>, window_params = [{transform_indices = @transform_0, window_bounds = array<i64: 1024, 128>}, {transform_indices = @transform_1, window_bounds = array<i64: 128, 128>}, {transform_indices = @transform_2, window_bounds = array<i64: 1024, 128>}, {transform_indices = @transform_3, window_bounds = array<i64: 1, 1, 128>}, {transform_indices = @transform_4, window_bounds = array<i64: 1, 1, 128>}]} {
    %c0_i32 = arith.constant 0 : i32
    %0 = arith.cmpi eq, %arg2, %c0_i32 : i32
    %1 = arith.extui %0 : i1 to i32
    %c0_i32_0 = arith.constant 0 : i32
    %2 = arith.cmpi ne, %1, %c0_i32_0 : i32
    scf.if %2 {
      %cst_10 = arith.constant 0.000000e+00 : f32
      %12 = vector.broadcast %cst_10 : f32 to vector<1024x128xf32>
      %c0_11 = arith.constant 0 : index
      %c0_12 = arith.constant 0 : index
      %13 = vector.load %arg8[%c0_11, %c0_12] : memref<1024x128xf32, #tpu.memory_space<vmem>>, vector<1024x128xf32>
      tpu.vector_store %arg8[%c0_11, %c0_12], %12 {strides = array<i32>} : memref<1024x128xf32, #tpu.memory_space<vmem>>, vector<1024x128xf32>,
    } else {
    }
    %c0 = arith.constant 0 : index
    %c0_1 = arith.constant 0 : index
    %3 = vector.load %arg8[%c0, %c0_1] : memref<1024x128xf32, #tpu.memory_space<vmem>>, vector<1024x128xf32>
    %c0_2 = arith.constant 0 : index
    %c0_3 = arith.constant 0 : index
    %4 = vector.load %arg3[%c0_2, %c0_3] : memref<1024x128xbf16, #tpu.memory_space<vmem>>, vector<1024x128xbf16>
    %c0_4 = arith.constant 0 : index
    %c0_5 = arith.constant 0 : index
    %5 = vector.load %arg4[%c0_4, %c0_5] : memref<128x128xbf16, #tpu.memory_space<vmem>>, vector<128x128xbf16>
    %cst = arith.constant dense<0.000000e+00> : vector<1024x128xf32>
    %6 = tpu.matmul %4, %5, %cst {dimension_numbers = #tpu.dot_dimension_numbers<[1], [0], [0], [1], [0, 0, 1, 1], [], []>} : vector<1024x128xbf16>, vector<128x128xbf16>, vector<1024x128xf32> -> vector<1024x128xf32>
    %7 = arith.addf %3, %6 : vector<1024x128xf32>
    %c0_6 = arith.constant 0 : index
    %c0_7 = arith.constant 0 : index
    %8 = vector.load %arg8[%c0_6, %c0_7] : memref<1024x128xf32, #tpu.memory_space<vmem>>, vector<1024x128xf32>
    tpu.vector_store %arg8[%c0_6, %c0_7], %7 {strides = array<i32>} : memref<1024x128xf32, #tpu.memory_space<vmem>>, vector<1024x128xf32>,
    %c0_i32_8 = arith.constant 0 : i32
    %9 = arith.cmpi eq, %arg2, %c0_i32_8 : i32
    %10 = arith.extui %9 : i1 to i32
    %c0_i32_9 = arith.constant 0 : i32
    %11 = arith.cmpi ne, %10, %c0_i32_9 : i32
    scf.if %11 {
      %c0_10 = arith.constant 0 : index
      %c0_11 = arith.constant 0 : index
      %12 = vector.load %arg8[%c0_10, %c0_11] : memref<1024x128xf32, #tpu.memory_space<vmem>>, vector<1024x128xf32>
      %cst_12 = arith.constant dense<0.000000e+00> : vector<128xf32>
      %13 = vector.multi_reduction <add>, %12, %cst_12 [0] : vector<1024x128xf32> to vector<128xf32>
      %14 = vector.shape_cast %13 : vector<128xf32> to vector<1x128xf32>
      %15 = vector.shape_cast %14 : vector<1x128xf32> to vector<1x1x128xf32>
      %c0_13 = arith.constant 0 : index
      %c0_14 = arith.constant 0 : index
      %c0_15 = arith.constant 0 : index
      %16 = vector.load %arg6[%c0_13, %c0_14, %c0_15] : memref<1x1x128xf32, #tpu.memory_space<vmem>>, vector<1x1x128xf32>
      tpu.vector_store %arg6[%c0_13, %c0_14, %c0_15], %15 {strides = array<i32>} : memref<1x1x128xf32, #tpu.memory_space<vmem>>, vector<1x1x128xf32>,
      %17 = arith.mulf %12, %12 : vector<1024x128xf32>
      %cst_16 = arith.constant dense<0.000000e+00> : vector<128xf32>
      %18 = vector.multi_reduction <add>, %17, %cst_16 [0] : vector<1024x128xf32> to vector<128xf32>
      %19 = vector.shape_cast %18 : vector<128xf32> to vector<1x128xf32>
      %20 = vector.shape_cast %19 : vector<1x128xf32> to vector<1x1x128xf32>
      %c0_17 = arith.constant 0 : index
      %c0_18 = arith.constant 0 : index
      %c0_19 = arith.constant 0 : index
      %21 = vector.load %arg7[%c0_17, %c0_18, %c0_19] : memref<1x1x128xf32, #tpu.memory_space<vmem>>, vector<1x1x128xf32>
      tpu.vector_store %arg7[%c0_17, %c0_18, %c0_19], %20 {strides = array<i32>} : memref<1x1x128xf32, #tpu.memory_space<vmem>>, vector<1x1x128xf32>,
      %22 = arith.truncf %12 : vector<1024x128xf32> to vector<1024x128xbf16>
      %c0_20 = arith.constant 0 : index
      %c0_21 = arith.constant 0 : index
      %23 = vector.load %arg5[%c0_20, %c0_21] : memref<1024x128xbf16, #tpu.memory_space<vmem>>, vector<1024x128xbf16>
      tpu.vector_store %arg5[%c0_20, %c0_21], %22 {strides = array<i32>} : memref<1024x128xbf16, #tpu.memory_space<vmem>>, vector<1024x128xbf16>,
    } else {
    }
    return
  }
  func.func @transform_0(%arg0: i32, %arg1: i32, %arg2: i32) -> (i32, i32) {
    %c0_i32 = arith.constant 0 : i32
    return %arg0, %arg2 : i32, i32
  }
  func.func @transform_1(%arg0: i32, %arg1: i32, %arg2: i32) -> (i32, i32) {
    %c0_i32 = arith.constant 0 : i32
    return %arg2, %arg1 : i32, i32
  }
  func.func @transform_2(%arg0: i32, %arg1: i32, %arg2: i32) -> (i32, i32) {
    %c0_i32 = arith.constant 0 : i32
    return %arg0, %arg1 : i32, i32
  }
  func.func @transform_3(%arg0: i32, %arg1: i32, %arg2: i32) -> (i32, i32, i32) {
    %c0_i32 = arith.constant 0 : i32
    %c0_i32_0 = arith.constant 0 : i32
    return %arg0, %c0_i32, %arg1 : i32, i32, i32
  }
  func.func @transform_4(%arg0: i32, %arg1: i32, %arg2: i32) -> (i32, i32, i32) {
    %c0_i32 = arith.constant 0 : i32
    %c0_i32_0 = arith.constant 0 : i32
    return %arg0, %c0_i32, %arg1 : i32, i32, i32
  }
}

</mosaic_0001>

<bundles_post_ra>
// kernel: tpu_custom_call.1
= control target key start
LH: loop header
LB: loop body
LE: loop exit
PB: predicated region body
PF: predicated region fallthrough
CT: control target
= control target key end

     0   :  { %s5429_s0 = inlined_call_operand.hbm [shape: bf16[2048,128], index: 0, kind: input, shape index: {}]   ;;  %s5430_s1 = inlined_call_operand.hbm [shape: bf16[128,128], index: 1, kind: input, shape index: {}]   ;;  %s5431_s2 = inlined_call_operand.hbm [shape: bf16[2048,128], index: 2, kind: output, shape index: {0}]   ;;  %s5432_s3 = inlined_call_operand.hbm [shape: f32[2,1,128], index: 3, kind: output, shape index: {1}]   ;;  %s5433_s4 = inlined_call_operand.hbm [shape: f32[2,1,128], index: 4, kind: output, shape index: {2}]  }
   0x1   :  { %5468 = sst [smem:[#allocation31_spill]] %s5430_s1 }
   0x2   :  { %10 = vsyncpa [#allocation4], 0 }
   0x3   :  { %12 = vsyncpa [#allocation4 + $0x1], 0 }
   0x4   :  { %13 = vsyncpa [#allocation7], 0 }
   0x5   :  { %14 = vsyncpa [#allocation5], 0 }
   0x6   :  { %16 = vsyncpa [#allocation5 + $0x1], 0 }
   0x7   :  { %17 = vsyncpa [#allocation10], 0 }
   0x8   :  { %19 = vsyncpa [#allocation10 + $0x1], 0  ;;  %s4655_s15 = smov 0   ;;  %s4657_s16 = smov 0  }
   0x9   :  { %s4659_s17 = smov 0   ;;  %s4661_s18 = smov 0  }
   0xa   :  { %s4663_s19 = smov 0   ;;  %s4665_s20 = smov 0  }
   0xb LB: > { %s4686_s21 = sadd.s32 4294967295, %s4619_s20   ;;  %s5434_s22 = sadd.s32 4294967294, %s4619_s20   ;;  %s4619_s20 = sphi %s4665_s20, %s25_s20   ;;  %s4615_s19 = sphi %s4663_s19, %s5519_s19   ;;  %s4611_s18 = sphi %s4661_s18, %s5518_s18   ;;  %s4607_s17 = sphi %s4659_s17, %s5517_s17   ;;  %s4603_s16 = sphi %s4657_s16, %s5516_s16   ;;  %s4599_s15 = sphi %s4655_s15, %s5515_s15  }
   0xc   : > { %p66_p0 = scmp.ne.s32.totalorder %s4603_s16, %s4599_s15  ;;  %p5437_p1 = scmp.eq.s32.totalorder %s4686_s21, 0 }
   0xd   : > { %p126_p3 = scmp.eq.s32.totalorder %s5434_s22, 1  ;;  %p3304_p5 = scmp.ge.s32.totalorder %s4619_s20, 1 }
   0xe   : > { %p4697_p4 = por %p5437_p1, %p66_p0  ;;  %p189_p7 = scmp.lt.s32.totalorder %s4619_s20, 3 }
   0xf   : > { %p4702_p6 = por %p126_p3, %p66_p0  ;;  %s4621_s26 = smov [#allocation6]  }
  0x10   : > { %p4707_p8 = pnand %p3304_p5, %p189_p7  ;;  %s205_s27 = sshll.u32 %s4621_s26, 4  ;;  %s206_s27 = int_to_ptr.vmem [resolvable:$true] %s205_s27 }
  0x11   : > { %s5470_s24 = scalar_select %p4702_p6, 1, 0 }
  0x12   : > { %p4278_p9 = pneg %p4707_p8  ;;  %s44_s29 = sadd.s32 1, %s4615_s19 }
  0x13   : > { %s4436_s30 = scalar_lea.vmem %s206_s27, 1024  ;;  %p4444_p5 = scmp.lt.s32.totalorder %s206_s27, %s206_s27 }
  0x14   : > { %p4716_p11 = pnand %p4278_p9, %p5437_p1  ;;  %p4437_p13 = scmp.ne.s32.totalorder %s206_s27, %s4436_s30 }
  0x15   : > { %p4445_p7 = scmp.lt.s32.totalorder %s4436_s30, %s4436_s30 }
  0x16   : > { %p4427_p12 = pneg %p4716_p11 }
  0x17   : > { %p4446_p2 = por %p4445_p7, %p4444_p5 }
  0x18   : > { %p4439_p0 = pnand %p4437_p13, %p4427_p12 }
  0x1a   : > { %p4440_p3 = pneg %p4439_p0 }
  0x1c   : > { %p4447_p6 = pnand %p4446_p2, %p4440_p3 }
  0x1e   : > { %4450 = shalt.err (!%p4447_p6)
}
  0x1f   : > { %s5435_s5 = smov 64   ;;  %s5436_s6 = smov 4  }
  0x20   : > { %s5473_s1 = sld [smem:[#allocation31_spill]]  ;;  %p46_p2 = scmp.ge.s32.totalorder %s44_s29, 2 }
  0x21   : > { %s53_s9 = sadd.s32 1, %s4607_s17  ;;  %p60_p6 = scmp.ne.s32.totalorder %s4607_s17, %s4603_s16 }
  0x22   : > { %p61_p9 = scmp.eq.s32.totalorder %s4619_s20, 0  ;;  %s5521_s29 = smov (%p46_p2, %s44_s29), 0 }
  0x23   : > { %p5475_p13 = scmp.eq.s32.totalorder %s4686_s21, 1  ;;  %s48_s12 = ssub.s32 %s4615_s19, %s5521_s29 }
  0x24   : > { %p4737_p12 = por %p61_p9, %p60_p6  ;;  %p4297_p3 = scmp.lt.s32.totalorder %s4619_s20, 2 }
  0x25   : > { %p4743_p0 = por %p5475_p13, %p60_p6  ;;  %s219_s13 = sand.u32 1, %s4607_s17  }
  0x26   : > { %4281 = dma.hbm_to_vmem [thread:$0]  (!%p4716_p11), %s5473_s1, 1024, %s206_s27, [#allocation7], %s5435_s5, %s5435_s5, %s5436_s6  }
  0x27   : > { %p51_p11 = scmp.eq.s32.totalorder %s48_s12, 0  ;;  %s3307_s14 = sshll.u32 %s219_s13, 9 }
  0x28   : > { %s3521_s27 = sshll.u32 %s4615_s19, 13  ;;  %s223_s8 = scalar_lea.vmem [#allocation3], %s3307_s14 }
  0x29   : > { %s4752_s26 = scalar_select %p51_p11, %s4607_s17, %s53_s9  }
  0x2a   : > { %s230_s7 = scalar_lea.hbm %s5429_s0, %s3521_s27  ;;  %s231_s22 = sshll.u32 %s223_s8, 4  ;;  %s232_s22 = int_to_ptr.vmem [resolvable:$true] %s231_s22 }
  0x2b   : > { %p4760_p5 = pnand %p4297_p3, %p4737_p12  ;;  %s220_s6 = scalar_lea.sflag [#allocation4], %s219_s13 }
  0x2c   : > { %s4464_s12 = scalar_lea.vmem %s232_s22, 8192  ;;  %s4624_s9 = smov [#allocation3]  }
  0x2d   : > { %p4453_p7 = pneg %p4760_p5  ;;  %p4465_p2 = scmp.ne.s32.totalorder %s232_s22, %s4464_s12 }
  0x2e   : > { %s4469_s1 = sshll.u32 %s4624_s9, 4  ;;  %s4470_s1 = int_to_ptr.vmem [resolvable:$false] %s4469_s1 }
  0x2f   : > { %p4467_p6 = pnand %p4465_p2, %p4453_p7  ;;  %s4471_s27 = scalar_lea.vmem %s4470_s1, 16384 }
  0x30   : > { %p4472_p13 = scmp.lt.s32.totalorder %s232_s22, %s4470_s1  ;;  %p4473_p11 = scmp.lt.s32.totalorder %s4471_s27, %s4464_s12 }
  0x31   : > { %p4468_p9 = pneg %p4467_p6 }
  0x32   : > { %p4474_p10 = por %p4473_p11, %p4472_p13 }
  0x34   : > { %p4475_p1 = pnand %p4474_p10, %p4468_p9 }
  0x36   : > { %4478 = shalt.err (!%p4475_p1)
}
  0x37   : > { %s5478_s10 = smov 4   ;;  %s5479_s14 = smov 64  }
  0x38   : > { %4285 = dma.hbm_to_vmem [thread:$0]  (!%p4760_p5), %s230_s7, 8192, %s232_s22, %s220_s6, %s5479_s14, %s5479_s14, %s5478_s10  }
  0x39   : > { %243 = sbr.rel (%p4707_p8) target bundleno = 611 (0x263), region = 28 }
  0x3e   : > { %s4774_s13 = sand.u32 1, %s4603_s16  }
  0x3f   : > { %s3311_s1 = sshll.u32 %s4774_s13, 9  ;;  %s246_s28 = scalar_lea.sflag [#allocation4], %s4774_s13 }
  0x40   : > { %s4780_s30 = scalar_lea.vmem [#allocation3], %s3311_s1 }
  0x41   : > { %4582 = dma.done.wait (%p4697_p4), %s246_s28, 8192  }
  0x42   : > { %4584 = vsyncadd (%p4697_p4), %s246_s28, 4294959104  ;;  %p5480_p1 = scmp.eq.s32.totalorder %s4686_s21, 0 }
  0x44   : > { %4586 = dma.done.wait (%p5480_p1), [#allocation7], 1024   ;;  %p5481_p8 = pmov %p5480_p1 }
  0x45   : > { %v4353_v0 = vld [vmem:[#allocation6 + $0x38] sm:$0xff]   ;;  %v4354_v1 = vld [vmem:[#allocation6 + $0x30] sm:$0xff]   ;;  %v4355_v2 = vld [vmem:[#allocation6 + $0x28] sm:$0xff]   ;;  %s4856_s22 = scalar_lea.vmem [#allocation8], %s3311_s1  ;;  %s3650_s23 = sshll.u32 %s4611_s18, 13 }
  0x46   : > { %4588 = vsyncadd (%p5481_p8), [#allocation7], 4294966272  ;;  %4106 = vmatprep.subr.bf16.mxu0 %v4353_v0  ;;  %4250 = vmatprep.subr.bf16.mxu1 %v4353_v0  ;;  %v4356_v3 = vld [vmem:[#allocation6 + $0x20] sm:$0xff]   ;;  %v4357_v5 = vld [vmem:[#allocation6 + $0x18] sm:$0xff]   ;;  %s3117_s25 = sshll.u32 %s4856_s22, 4  ;;  %s5146_s7 = scalar_lea.hbm %s5431_s2, %s3650_s23  ;;  %s5148_s25 = int_to_ptr.vmem [resolvable:$true] %s3117_s25 }
  0x47   : > { %4107 = vmatpush3.bf16.msra.mxu0 %v4353_v0  ;;  %4258 = vmatpush3.bf16.msra.mxu1 %v4353_v0  ;;  %v4361_v4 = vld [vmem:[%s4780_s30] sm:$0xff]   ;;  %v4358_v6 = vld [vmem:[#allocation6 + $0x10] sm:$0xff]   ;;  %v4359_v7 = vld [vmem:[#allocation6 + $0x8] sm:$0xff]   ;;  %s3095_s8 = scalar_lea.sflag [#allocation5], %s4774_s13  ;;  %s4479_s12 = scalar_lea.vmem %s5148_s25, 8192 }
  0x48   : > { %4108 = vmatprep.subr.bf16.mxu0 %v4354_v1  ;;  %4251 = vmatprep.subr.bf16.mxu1 %v4354_v1  ;;  %v4360_v8 = vld [vmem:[#allocation6] sm:$0xff]   ;;  %v4362_v9 = vld [vmem:[%s4780_s30 + $0x8] sm:$0xff]   ;;  %v4363_v10 = vld [vmem:[%s4780_s30 + $0x10] sm:$0xff]   ;;  %p4480_p4 = scmp.ne.s32.totalorder %s5148_s25, %s4479_s12  ;;  %s4625_s9 = smov [#allocation8]  }
  0x49   : > { %4122 = vmatprep.mubr.bf16.mxu0 %v4361_v4  ;;  %v4364_v11 = vld [vmem:[%s4780_s30 + $0x18] sm:$0xff]   ;;  %v4365_v12 = vld [vmem:[%s4780_s30 + $0x20] sm:$0xff]   ;;  %v4394_v14 = vld [vmem:[%s4780_s30 + $0x108] sm:$0xff]   ;;  %s4483_s27 = sshll.u32 %s4625_s9, 4  ;;  %s4484_s27 = int_to_ptr.vmem [resolvable:$false] %s4483_s27 }
  0x4a   : > { %v4393_v13 = vld [vmem:[%s4780_s30 + $0x100] sm:$0xff]   ;;  %v4395_v15 = vld [vmem:[%s4780_s30 + $0x110] sm:$0xff]   ;;  %v4366_v16 = vld [vmem:[%s4780_s30 + $0x28] sm:$0xff]   ;;  %p4481_p10 = pnand %p4480_p4, %p4743_p0  ;;  %s4485_s10 = scalar_lea.vmem %s4484_s27, 16384 }
  0x4b   : > { %4109 = vmatpush3.bf16.msra.mxu0 %v4354_v1  ;;  %4259 = vmatpush3.bf16.msra.mxu1 %v4354_v1  ;;  %v4367_v17 = vld [vmem:[%s4780_s30 + $0x30] sm:$0xff]   ;;  %v4396_v18 = vld [vmem:[%s4780_s30 + $0x118] sm:$0xff]   ;;  %v4397_v19 = vld [vmem:[%s4780_s30 + $0x120] sm:$0xff]   ;;  %p4486_p3 = scmp.lt.s32.totalorder %s5148_s25, %s4484_s27  ;;  %p4487_p5 = scmp.lt.s32.totalorder %s4485_s10, %s4479_s12 }
  0x4c   : > { %4110 = vmatprep.subr.bf16.mxu0 %v4355_v2  ;;  %4252 = vmatprep.subr.bf16.mxu1 %v4355_v2  ;;  %v4368_v20 = vld [vmem:[%s4780_s30 + $0x38] sm:$0xff]   ;;  %v4369_v21 = vld [vmem:[%s4780_s30 + $0x40] sm:$0xff]   ;;  %v4398_v22 = vld [vmem:[%s4780_s30 + $0x128] sm:$0xff]   ;;  %p4482_p12 = pneg %p4481_p10 }
  0x4d   : > { %4186 = vmatprep.mubr.bf16.mxu1 %v4393_v13  ;;  %v4399_v23 = vld [vmem:[%s4780_s30 + $0x130] sm:$0xff]   ;;  %v4370_v24 = vld [vmem:[%s4780_s30 + $0x48] sm:$0xff]   ;;  %v4400_v26 = vld [vmem:[%s4780_s30 + $0x138] sm:$0xff]   ;;  %p4488_p7 = por %p4487_p5, %p4486_p3 }
  0x4e   : > { %v4371_v25 = vld [vmem:[%s4780_s30 + $0x50] sm:$0xff]   ;;  %v4401_v27 = vld [vmem:[%s4780_s30 + $0x140] sm:$0xff]   ;;  %v4372_v28 = vld [vmem:[%s4780_s30 + $0x58] sm:$0xff]  }
  0x4f   : > { %4111 = vmatpush3.bf16.msra.mxu0 %v4355_v2  ;;  %4260 = vmatpush3.bf16.msra.mxu1 %v4355_v2  ;;  %v4373_v29 = vld [vmem:[%s4780_s30 + $0x60] sm:$0xff]   ;;  %v4402_v30 = vld [vmem:[%s4780_s30 + $0x148] sm:$0xff]   ;;  %v4403_v31 = vld [vmem:[%s4780_s30 + $0x150] sm:$0xff]   ;;  %p4489_p2 = pnand %p4488_p7, %p4482_p12 }
  0x50   : > { %4112 = vmatprep.subr.bf16.mxu0 %v4356_v3  ;;  %4253 = vmatprep.subr.bf16.mxu1 %v4356_v3  ;;  %v4374_v32 = vld [vmem:[%s4780_s30 + $0x68] sm:$0xff]   ;;  %v4375_v33 = vld [vmem:[%s4780_s30 + $0x70] sm:$0xff]   ;;  %v4404_v34 = vld [vmem:[%s4780_s30 + $0x158] sm:$0xff]  }
  0x51   : > { %v4405_v35 = vld [vmem:[%s4780_s30 + $0x160] sm:$0xff]   ;;  %v4376_v36 = vld [vmem:[%s4780_s30 + $0x78] sm:$0xff]   ;;  %v4406_v38 = vld [vmem:[%s4780_s30 + $0x168] sm:$0xff]  }
  0x52   : > { %v4377_v37 = vld [vmem:[%s4780_s30 + $0x80] sm:$0xff]   ;;  %v4407_v39 = vld [vmem:[%s4780_s30 + $0x170] sm:$0xff]   ;;  %v4378_v40 = vld [vmem:[%s4780_s30 + $0x88] sm:$0xff]  }
  0x53   : > { %4113 = vmatpush3.bf16.msra.mxu0 %v4356_v3  ;;  %4261 = vmatpush3.bf16.msra.mxu1 %v4356_v3  ;;  %v4379_v41 = vld [vmem:[%s4780_s30 + $0x90] sm:$0xff]   ;;  %v4408_v42 = vld [vmem:[%s4780_s30 + $0x178] sm:$0xff]   ;;  %v4409_v43 = vld [vmem:[%s4780_s30 + $0x180] sm:$0xff]  }
  0x54   : > { %4114 = vmatprep.subr.bf16.mxu0 %v4357_v5  ;;  %4254 = vmatprep.subr.bf16.mxu1 %v4357_v5  ;;  %v4380_v44 = vld [vmem:[%s4780_s30 + $0x98] sm:$0xff]   ;;  %v4381_v45 = vld [vmem:[%s4780_s30 + $0xa0] sm:$0xff]   ;;  %v4410_v46 = vld [vmem:[%s4780_s30 + $0x188] sm:$0xff]  }
  0x55   : > { %v4411_v47 = vld [vmem:[%s4780_s30 + $0x190] sm:$0xff]   ;;  %v4382_v48 = vld [vmem:[%s4780_s30 + $0xa8] sm:$0xff]   ;;  %v4412_v50 = vld [vmem:[%s4780_s30 + $0x198] sm:$0xff]  }
  0x56   : > { %v4383_v49 = vld [vmem:[%s4780_s30 + $0xb0] sm:$0xff]   ;;  %v4413_v51 = vld [vmem:[%s4780_s30 + $0x1a0] sm:$0xff]   ;;  %v4384_v52 = vld [vmem:[%s4780_s30 + $0xb8] sm:$0xff]  }
  0x57   : > { %4115 = vmatpush3.bf16.msra.mxu0 %v4357_v5  ;;  %4262 = vmatpush3.bf16.msra.mxu1 %v4357_v5  ;;  %v4385_v53 = vld [vmem:[%s4780_s30 + $0xc0] sm:$0xff]   ;;  %v4414_v54 = vld [vmem:[%s4780_s30 + $0x1a8] sm:$0xff]   ;;  %v4415_v55 = vld [vmem:[%s4780_s30 + $0x1b0] sm:$0xff]  }
  0x58   : > { %4116 = vmatprep.subr.bf16.mxu0 %v4358_v6  ;;  %4255 = vmatprep.subr.bf16.mxu1 %v4358_v6  ;;  %v4386_v56 = vld [vmem:[%s4780_s30 + $0xc8] sm:$0xff]   ;;  %v4387_v57 = vld [vmem:[%s4780_s30 + $0xd0] sm:$0xff]   ;;  %v4416_v58 = vld [vmem:[%s4780_s30 + $0x1b8] sm:$0xff]  }
  0x59   : > { %v4417_v59 = vld [vmem:[%s4780_s30 + $0x1c0] sm:$0xff]   ;;  %v4388_v60 = vld [vmem:[%s4780_s30 + $0xd8] sm:$0xff]   ;;  %v4418_v62 = vld [vmem:[%s4780_s30 + $0x1c8] sm:$0xff]  }
  0x5a   : > { %v4389_v61 = vld [vmem:[%s4780_s30 + $0xe0] sm:$0xff]   ;;  %v4419_v63 = vld [vmem:[%s4780_s30 + $0x1d0] sm:$0xff]   ;;  %v4390_v0 = vld [vmem:[%s4780_s30 + $0xe8] sm:$0xff]  }
  0x5b   : > { %4117 = vmatpush3.bf16.msra.mxu0 %v4358_v6  ;;  %4263 = vmatpush3.bf16.msra.mxu1 %v4358_v6  ;;  %v4391_v1 = vld [vmem:[%s4780_s30 + $0xf0] sm:$0xff]   ;;  %v4420_v2 = vld [vmem:[%s4780_s30 + $0x1d8] sm:$0xff]   ;;  %v4421_v3 = vld [vmem:[%s4780_s30 + $0x1e0] sm:$0xff]  }
  0x5c   : > { %4118 = vmatprep.subr.bf16.mxu0 %v4359_v7  ;;  %4256 = vmatprep.subr.bf16.mxu1 %v4359_v7  ;;  %v4392_v4 = vld [vmem:[%s4780_s30 + $0xf8] sm:$0xff]   ;;  %v4422_v5 = vld [vmem:[%s4780_s30 + $0x1e8] sm:$0xff]   ;;  %v4423_v6 = vld [vmem:[%s4780_s30 + $0x1f0] sm:$0xff]  }
  0x5f   : > { %4119 = vmatpush3.bf16.msra.mxu0 %v4359_v7  ;;  %4264 = vmatpush3.bf16.msra.mxu1 %v4359_v7  ;;  %v4424_v7 = vld [vmem:[%s4780_s30 + $0x1f8] sm:$0xff]  }
  0x60   : > { %4120 = vmatprep.subr.bf16.mxu0 %v4360_v8  ;;  %4257 = vmatprep.subr.bf16.mxu1 %v4360_v8 }
  0x63   : > { %4121 = vmatpush3.bf16.msra.mxu0 %v4360_v8  ;;  %4265 = vmatpush3.bf16.msra.mxu1 %v4360_v8 }
  0x66   : > { %4123 = vmatmul.mubr.bf16.vlgmr.msra.gmra.mxu0 %v4362_v9  ;;  %4187 = vmatmul.mubr.bf16.vlgmr.msra.gmra.mxu1 %v4394_v14 }
  0x67   : > { %4126 = vmatprep.mubr.bf16.mxu0 %v4363_v10  ;;  %4190 = vmatprep.mubr.bf16.mxu1 %v4395_v15 }
  0x6e   : > { %4127 = vmatmul.mubr.bf16.gmra.mxu0 %v4364_v11  ;;  %4191 = vmatmul.mubr.bf16.gmra.mxu1 %v4396_v18 }
  0x6f   : > { %4130 = vmatprep.mubr.bf16.mxu0 %v4365_v12  ;;  %4194 = vmatprep.mubr.bf16.mxu1 %v4397_v19 }
  0x76   : > { %4131 = vmatmul.mubr.bf16.gmra.mxu0 %v4366_v16  ;;  %4195 = vmatmul.mubr.bf16.gmra.mxu1 %v4398_v22 }
  0x77   : > { %4134 = vmatprep.mubr.bf16.mxu0 %v4367_v17  ;;  %4198 = vmatprep.mubr.bf16.mxu1 %v4399_v23 }
  0x7e   : > { %4135 = vmatmul.mubr.bf16.gmra.mxu0 %v4368_v20  ;;  %4199 = vmatmul.mubr.bf16.gmra.mxu1 %v4400_v26 }
  0x7f   : > { %4138 = vmatprep.mubr.bf16.mxu0 %v4369_v21  ;;  %4202 = vmatprep.mubr.bf16.mxu1 %v4401_v27 }
  0x86   : > { %4139 = vmatmul.mubr.bf16.gmra.mxu0 %v4370_v24  ;;  %4203 = vmatmul.mubr.bf16.gmra.mxu1 %v4402_v30 }
  0x87   : > { %4142 = vmatprep.mubr.bf16.mxu0 %v4371_v25  ;;  %4206 = vmatprep.mubr.bf16.mxu1 %v4403_v31 }
  0x8e   : > { %4143 = vmatmul.mubr.bf16.gmra.mxu0 %v4372_v28  ;;  %4207 = vmatmul.mubr.bf16.gmra.mxu1 %v4404_v34 }
  0x8f   : > { %4146 = vmatprep.mubr.bf16.mxu0 %v4373_v29  ;;  %4210 = vmatprep.mubr.bf16.mxu1 %v4405_v35 }
  0x96   : > { %4147 = vmatmul.mubr.bf16.gmra.mxu0 %v4374_v32  ;;  %4211 = vmatmul.mubr.bf16.gmra.mxu1 %v4406_v38 }
  0x97   : > { %4150 = vmatprep.mubr.bf16.mxu0 %v4375_v33  ;;  %4214 = vmatprep.mubr.bf16.mxu1 %v4407_v39 }
  0x9e   : > { %4151 = vmatmul.mubr.bf16.gmra.mxu0 %v4376_v36  ;;  %4215 = vmatmul.mubr.bf16.gmra.mxu1 %v4408_v42 }
  0x9f   : > { %4154 = vmatprep.mubr.bf16.mxu0 %v4377_v37  ;;  %4218 = vmatprep.mubr.bf16.mxu1 %v4409_v43 }
  0xa6   : > { %4155 = vmatmul.mubr.bf16.gmra.mxu0 %v4378_v40  ;;  %4219 = vmatmul.mubr.bf16.gmra.mxu1 %v4410_v46 }
  0xa7   : > { %4158 = vmatprep.mubr.bf16.mxu0 %v4379_v41  ;;  %4222 = vmatprep.mubr.bf16.mxu1 %v4411_v47 }
  0xae   : > { %4159 = vmatmul.mubr.bf16.gmra.mxu0 %v4380_v44  ;;  %4223 = vmatmul.mubr.bf16.gmra.mxu1 %v4412_v50 }
  0xaf   : > { %4162 = vmatprep.mubr.bf16.mxu0 %v4381_v45  ;;  %4226 = vmatprep.mubr.bf16.mxu1 %v4413_v51 }
  0xb6   : > { %4163 = vmatmul.mubr.bf16.gmra.mxu0 %v4382_v48  ;;  %4227 = vmatmul.mubr.bf16.gmra.mxu1 %v4414_v54 }
  0xb7   : > { %4166 = vmatprep.mubr.bf16.mxu0 %v4383_v49  ;;  %4230 = vmatprep.mubr.bf16.mxu1 %v4415_v55 }
  0xbe   : > { %4167 = vmatmul.mubr.bf16.gmra.mxu0 %v4384_v52  ;;  %4231 = vmatmul.mubr.bf16.gmra.mxu1 %v4416_v58 }
  0xbf   : > { %4170 = vmatprep.mubr.bf16.mxu0 %v4385_v53  ;;  %4234 = vmatprep.mubr.bf16.mxu1 %v4417_v59 }
  0xc6   : > { %4171 = vmatmul.mubr.bf16.gmra.mxu0 %v4386_v56  ;;  %4235 = vmatmul.mubr.bf16.gmra.mxu1 %v4418_v62 }
  0xc7   : > { %4174 = vmatprep.mubr.bf16.mxu0 %v4387_v57  ;;  %4238 = vmatprep.mubr.bf16.mxu1 %v4419_v63 }
  0xce   : > { %4175 = vmatmul.mubr.bf16.gmra.mxu0 %v4388_v60  ;;  %4239 = vmatmul.mubr.bf16.gmra.mxu1 %v4420_v2 }
  0xcf   : > { %4178 = vmatprep.mubr.bf16.mxu0 %v4389_v61  ;;  %4242 = vmatprep.mubr.bf16.mxu1 %v4421_v3 }
  0xd6   : > { %4179 = vmatmul.mubr.bf16.gmra.mxu0 %v4390_v0  ;;  %4243 = vmatmul.mubr.bf16.gmra.mxu1 %v4422_v5 }
  0xd7   : > { %4182 = vmatprep.mubr.bf16.mxu0 %v4391_v1  ;;  %4246 = vmatprep.mubr.bf16.mxu1 %v4423_v6 }
  0xde   : > { %4183 = vmatmul.mubr.bf16.gmra.mxu0 %v4392_v4  ;;  %4247 = vmatmul.mubr.bf16.gmra.mxu1 %v4424_v7 }
 0x126   : > { %v4124_v8 = vpop.f32.mrf.mxu0  ;;  %v4860_v21 = vpop.f32.mrf.mxu1 }
 0x127   : > { %v2194_v18 = vmul.f32 %v4124_v8, %v4124_v8 }
 0x128   : > { %v1160_v9 = vpop.f32.mrf.mxu0  ;;  %v4862_v26 = vpop.f32.mrf.mxu1 }
 0x129   : > { %v2192_v13 = vmul.f32 %v1160_v9, %v1160_v9 }
 0x12a   : > { %v4125_v10 = vpop.f32.mrf.mxu0  ;;  %v4864_v32 = vpop.f32.mrf.mxu1 }
 0x12b   : > { %v3659_v11 = vpack.c.bf16 %v4125_v10, %v4124_v8  ;;  %v2195_v23 = vmul.f32 %v4125_v10, %v4125_v10  ;;  %v3819_v34 = vpack.c.bf16 %v4864_v32, %v4860_v21 }
 0x12c   : > { %v1163_v12 = vpop.f32.mrf.mxu0  ;;  %v4869_v39 = vpop.f32.mrf.mxu1 }
 0x12d   : > { %3971 = vst [vmem:[%s4856_s22 + $0x8] sm:$0xff] %v3659_v11   ;;  %v2058_v14 = vadd.f32 %v1163_v12, %v1160_v9  ;;  %v2193_v15 = vmul.f32 %v1163_v12, %v1163_v12  ;;  %v3654_v16 = vpack.c.bf16 %v1163_v12, %v1160_v9  ;;  %4003 = vst [vmem:[%s4856_s22 + $0x108] sm:$0xff] %v3819_v34  }
 0x12e   : > { %v4128_v17 = vpop.f32.mrf.mxu0  ;;  %v3814_v41 = vpack.c.bf16 %v4869_v39, %v4862_v26  ;;  %v4875_v45 = vpop.f32.mrf.mxu1 }
 0x12f   : > { %v2059_v19 = vadd.f32 %v4124_v8, %v2058_v14  ;;  %v2320_v20 = vadd.f32 %v2193_v15, %v2192_v13  ;;  %3655 = vst [vmem:[%s4856_s22] sm:$0xff] %v3654_v16   ;;  %v2198_v42 = vmul.f32 %v4128_v17, %v4128_v17 }
 0x130   : > { %v1176_v22 = vpop.f32.mrf.mxu0  ;;  %4002 = vst [vmem:[%s4856_s22 + $0x100] sm:$0xff] %v3814_v41   ;;  %v4878_v50 = vpop.f32.mrf.mxu1 }
 0x131   : > { %v2060_v24 = vadd.f32 %v4125_v10, %v2059_v19  ;;  %v2321_v25 = vadd.f32 %v2320_v20, %v2194_v18  ;;  %v2196_v30 = vmul.f32 %v1176_v22, %v1176_v22 }
 0x132   : > { %v4129_v27 = vpop.f32.mrf.mxu0  ;;  %v4880_v56 = vpop.f32.mrf.mxu1 }
 0x133   : > { %v2322_v28 = vadd.f32 %v2321_v25, %v2195_v23  ;;  %v2061_v29 = vadd.f32 %v2060_v24, %v1176_v22  ;;  %v3669_v31 = vpack.c.bf16 %v4129_v27, %v4128_v17  ;;  %v2199_v47 = vmul.f32 %v4129_v27, %v4129_v27 }
 0x134   : > { %v1179_v33 = vpop.f32.mrf.mxu0  ;;  %v3829_v58 = vpack.c.bf16 %v4880_v56, %v4875_v45  ;;  %v4885_v63 = vpop.f32.mrf.mxu1 }
 0x135   : > { %v2323_v35 = vadd.f32 %v2322_v28, %v2196_v30  ;;  %3973 = vst [vmem:[%s4856_s22 + $0x18] sm:$0xff] %v3669_v31   ;;  %v2062_v36 = vadd.f32 %v2061_v29, %v1179_v33  ;;  %v2197_v37 = vmul.f32 %v1179_v33, %v1179_v33  ;;  %v3664_v38 = vpack.c.bf16 %v1179_v33, %v1176_v22 }
 0x136   : > { %v4132_v40 = vpop.f32.mrf.mxu0  ;;  %4005 = vst [vmem:[%s4856_s22 + $0x118] sm:$0xff] %v3829_v58   ;;  %v3824_v1 = vpack.c.bf16 %v4885_v63, %v4878_v50  ;;  %v4891_v5 = vpop.f32.mrf.mxu1 }
 0x137   : > { %v2063_v43 = vadd.f32 %v4128_v17, %v2062_v36  ;;  %v2324_v44 = vadd.f32 %v2323_v35, %v2197_v37  ;;  %3972 = vst [vmem:[%s4856_s22 + $0x10] sm:$0xff] %v3664_v38   ;;  %v2202_v2 = vmul.f32 %v4132_v40, %v4132_v40 }
 0x138   : > { %v1192_v46 = vpop.f32.mrf.mxu0  ;;  %4004 = vst [vmem:[%s4856_s22 + $0x110] sm:$0xff] %v3824_v1   ;;  %v4894_v10 = vpop.f32.mrf.mxu1 }
 0x139   : > { %v2325_v48 = vadd.f32 %v2324_v44, %v2198_v42  ;;  %v2064_v49 = vadd.f32 %v4129_v27, %v2063_v43  ;;  %v2200_v53 = vmul.f32 %v1192_v46, %v1192_v46 }
 0x13a   : > { %v4133_v51 = vpop.f32.mrf.mxu0  ;;  %v4896_v16 = vpop.f32.mrf.mxu1 }
 0x13b   : > { %v2065_v52 = vadd.f32 %v2064_v49, %v1192_v46  ;;  %v2326_v54 = vadd.f32 %v2325_v48, %v2199_v47  ;;  %v3679_v55 = vpack.c.bf16 %v4133_v51, %v4132_v40  ;;  %v2203_v7 = vmul.f32 %v4133_v51, %v4133_v51 }
 0x13c   : > { %v1195_v57 = vpop.f32.mrf.mxu0  ;;  %v3839_v18 = vpack.c.bf16 %v4896_v16, %v4891_v5  ;;  %v4901_v24 = vpop.f32.mrf.mxu1 }
 0x13d   : > { %v2327_v59 = vadd.f32 %v2326_v54, %v2200_v53  ;;  %3975 = vst [vmem:[%s4856_s22 + $0x28] sm:$0xff] %v3679_v55   ;;  %v2066_v60 = vadd.f32 %v2065_v52, %v1195_v57  ;;  %v2201_v61 = vmul.f32 %v1195_v57, %v1195_v57  ;;  %v3674_v62 = vpack.c.bf16 %v1195_v57, %v1192_v46 }
 0x13e   : > { %v4136_v0 = vpop.f32.mrf.mxu0  ;;  %4007 = vst [vmem:[%s4856_s22 + $0x128] sm:$0xff] %v3839_v18   ;;  %v3834_v27 = vpack.c.bf16 %v4901_v24, %v4894_v10  ;;  %v4907_v31 = vpop.f32.mrf.mxu1 }
 0x13f   : > { %v2067_v3 = vadd.f32 %v4132_v40, %v2066_v60  ;;  %v2328_v4 = vadd.f32 %v2327_v59, %v2201_v61  ;;  %3974 = vst [vmem:[%s4856_s22 + $0x20] sm:$0xff] %v3674_v62   ;;  %v2206_v28 = vmul.f32 %v4136_v0, %v4136_v0 }
 0x140   : > { %v1208_v6 = vpop.f32.mrf.mxu0  ;;  %4006 = vst [vmem:[%s4856_s22 + $0x120] sm:$0xff] %v3834_v27   ;;  %v4910_v37 = vpop.f32.mrf.mxu1 }
 0x141   : > { %v2329_v8 = vadd.f32 %v2328_v4, %v2202_v2  ;;  %v2068_v9 = vadd.f32 %v4133_v51, %v2067_v3  ;;  %v2204_v13 = vmul.f32 %v1208_v6, %v1208_v6 }
 0x142   : > { %v4137_v11 = vpop.f32.mrf.mxu0  ;;  %v4912_v44 = vpop.f32.mrf.mxu1 }
 0x143   : > { %v2069_v12 = vadd.f32 %v2068_v9, %v1208_v6  ;;  %v2330_v14 = vadd.f32 %v2329_v8, %v2203_v7  ;;  %v3689_v15 = vpack.c.bf16 %v4137_v11, %v4136_v0  ;;  %v2207_v34 = vmul.f32 %v4137_v11, %v4137_v11 }
 0x144   : > { %v1211_v17 = vpop.f32.mrf.mxu0  ;;  %v3849_v47 = vpack.c.bf16 %v4912_v44, %v4907_v31  ;;  %v4917_v53 = vpop.f32.mrf.mxu1 }
 0x145   : > { %v2331_v19 = vadd.f32 %v2330_v14, %v2204_v13  ;;  %3977 = vst [vmem:[%s4856_s22 + $0x38] sm:$0xff] %v3689_v15   ;;  %v2070_v20 = vadd.f32 %v2069_v12, %v1211_v17  ;;  %v2205_v22 = vmul.f32 %v1211_v17, %v1211_v17  ;;  %v3684_v23 = vpack.c.bf16 %v1211_v17, %v1208_v6 }
 0x146   : > { %v4140_v25 = vpop.f32.mrf.mxu0  ;;  %4009 = vst [vmem:[%s4856_s22 + $0x138] sm:$0xff] %v3849_v47   ;;  %v3844_v55 = vpack.c.bf16 %v4917_v53, %v4910_v37  ;;  %v4923_v60 = vpop.f32.mrf.mxu1 }
 0x147   : > { %v2071_v29 = vadd.f32 %v4136_v0, %v2070_v20  ;;  %v2332_v30 = vadd.f32 %v2331_v19, %v2205_v22  ;;  %3976 = vst [vmem:[%s4856_s22 + $0x30] sm:$0xff] %v3684_v23   ;;  %v2210_v57 = vmul.f32 %v4140_v25, %v4140_v25 }
 0x148   : > { %v1224_v33 = vpop.f32.mrf.mxu0  ;;  %4008 = vst [vmem:[%s4856_s22 + $0x130] sm:$0xff] %v3844_v55   ;;  %v4926_v2 = vpop.f32.mrf.mxu1 }
 0x149   : > { %v2333_v35 = vadd.f32 %v2332_v30, %v2206_v28  ;;  %v2072_v36 = vadd.f32 %v4137_v11, %v2071_v29  ;;  %v2208_v41 = vmul.f32 %v1224_v33, %v1224_v33 }
 0x14a   : > { %v4141_v38 = vpop.f32.mrf.mxu0  ;;  %v4928_v9 = vpop.f32.mrf.mxu1 }
 0x14b   : > { %v2073_v40 = vadd.f32 %v2072_v36, %v1224_v33  ;;  %v2334_v42 = vadd.f32 %v2333_v35, %v2207_v34  ;;  %v3699_v43 = vpack.c.bf16 %v4141_v38, %v4140_v25  ;;  %v2211_v62 = vmul.f32 %v4141_v38, %v4141_v38 }
 0x14c   : > { %v1227_v46 = vpop.f32.mrf.mxu0  ;;  %v3859_v12 = vpack.c.bf16 %v4928_v9, %v4923_v60  ;;  %v4933_v18 = vpop.f32.mrf.mxu1 }
 0x14d   : > { %v2335_v48 = vadd.f32 %v2334_v42, %v2208_v41  ;;  %3979 = vst [vmem:[%s4856_s22 + $0x48] sm:$0xff] %v3699_v43   ;;  %v2074_v49 = vadd.f32 %v2073_v40, %v1227_v46  ;;  %v2209_v51 = vmul.f32 %v1227_v46, %v1227_v46  ;;  %v3694_v52 = vpack.c.bf16 %v1227_v46, %v1224_v33 }
 0x14e   : > { %v4144_v54 = vpop.f32.mrf.mxu0  ;;  %4011 = vst [vmem:[%s4856_s22 + $0x148] sm:$0xff] %v3859_v12   ;;  %v3854_v20 = vpack.c.bf16 %v4933_v18, %v4926_v2  ;;  %v4939_v27 = vpop.f32.mrf.mxu1 }
 0x14f   : > { %v2075_v58 = vadd.f32 %v4140_v25, %v2074_v49  ;;  %v2336_v59 = vadd.f32 %v2335_v48, %v2209_v51  ;;  %3978 = vst [vmem:[%s4856_s22 + $0x40] sm:$0xff] %v3694_v52   ;;  %v2214_v22 = vmul.f32 %v4144_v54, %v4144_v54 }
 0x150   : > { %v1240_v61 = vpop.f32.mrf.mxu0  ;;  %4010 = vst [vmem:[%s4856_s22 + $0x140] sm:$0xff] %v3854_v20   ;;  %v4942_v34 = vpop.f32.mrf.mxu1 }
 0x151   : > { %v2337_v0 = vadd.f32 %v2336_v59, %v2210_v57  ;;  %v2076_v1 = vadd.f32 %v4141_v38, %v2075_v58  ;;  %v2212_v6 = vmul.f32 %v1240_v61, %v1240_v61 }
 0x152   : > { %v4145_v3 = vpop.f32.mrf.mxu0  ;;  %v4944_v42 = vpop.f32.mrf.mxu1 }
 0x153   : > { %v2077_v4 = vadd.f32 %v2076_v1, %v1240_v61  ;;  %v2338_v7 = vadd.f32 %v2337_v0, %v2211_v62  ;;  %v3709_v8 = vpack.c.bf16 %v4145_v3, %v4144_v54  ;;  %v2215_v29 = vmul.f32 %v4145_v3, %v4145_v3 }
 0x154   : > { %v1243_v11 = vpop.f32.mrf.mxu0  ;;  %v3869_v46 = vpack.c.bf16 %v4944_v42, %v4939_v27  ;;  %v4949_v52 = vpop.f32.mrf.mxu1 }
 0x155   : > { %v2339_v13 = vadd.f32 %v2338_v7, %v2212_v6  ;;  %3981 = vst [vmem:[%s4856_s22 + $0x58] sm:$0xff] %v3709_v8   ;;  %v2078_v14 = vadd.f32 %v2077_v4, %v1243_v11  ;;  %v2213_v15 = vmul.f32 %v1243_v11, %v1243_v11  ;;  %v3704_v17 = vpack.c.bf16 %v1243_v11, %v1240_v61 }
 0x156   : > { %v4148_v19 = vpop.f32.mrf.mxu0  ;;  %4013 = vst [vmem:[%s4856_s22 + $0x158] sm:$0xff] %v3869_v46   ;;  %v3864_v55 = vpack.c.bf16 %v4949_v52, %v4942_v34  ;;  %v4955_v61 = vpop.f32.mrf.mxu1 }
 0x157   : > { %v2079_v23 = vadd.f32 %v4144_v54, %v2078_v14  ;;  %v2340_v25 = vadd.f32 %v2339_v13, %v2213_v15  ;;  %3980 = vst [vmem:[%s4856_s22 + $0x50] sm:$0xff] %v3704_v17   ;;  %v2218_v57 = vmul.f32 %v4148_v19, %v4148_v19 }
 0x158   : > { %v1256_v28 = vpop.f32.mrf.mxu0  ;;  %4012 = vst [vmem:[%s4856_s22 + $0x150] sm:$0xff] %v3864_v55   ;;  %v4958_v4 = vpop.f32.mrf.mxu1 }
 0x159   : > { %v2341_v30 = vadd.f32 %v2340_v25, %v2214_v22  ;;  %v2080_v33 = vadd.f32 %v4145_v3, %v2079_v23  ;;  %v2216_v38 = vmul.f32 %v1256_v28, %v1256_v28 }
 0x15a   : > { %v4149_v35 = vpop.f32.mrf.mxu0  ;;  %v4960_v13 = vpop.f32.mrf.mxu1 }
 0x15b   : > { %v2081_v36 = vadd.f32 %v2080_v33, %v1256_v28  ;;  %v2342_v40 = vadd.f32 %v2341_v30, %v2215_v29  ;;  %v3719_v41 = vpack.c.bf16 %v4149_v35, %v4148_v19  ;;  %v2219_v0 = vmul.f32 %v4149_v35, %v4149_v35 }
 0x15c   : > { %v1259_v43 = vpop.f32.mrf.mxu0  ;;  %v3879_v15 = vpack.c.bf16 %v4960_v13, %v4955_v61  ;;  %v4965_v23 = vpop.f32.mrf.mxu1 }
 0x15d   : > { %v2343_v47 = vadd.f32 %v2342_v40, %v2216_v38  ;;  %3983 = vst [vmem:[%s4856_s22 + $0x68] sm:$0xff] %v3719_v41   ;;  %v2082_v48 = vadd.f32 %v2081_v36, %v1259_v43  ;;  %v2217_v49 = vmul.f32 %v1259_v43, %v1259_v43  ;;  %v3714_v51 = vpack.c.bf16 %v1259_v43, %v1256_v28 }
 0x15e   : > { %v4152_v54 = vpop.f32.mrf.mxu0  ;;  %4015 = vst [vmem:[%s4856_s22 + $0x168] sm:$0xff] %v3879_v15   ;;  %v3874_v28 = vpack.c.bf16 %v4965_v23, %v4958_v4 }
 0x15f   : > { %v2083_v58 = vadd.f32 %v4148_v19, %v2082_v48  ;;  %v2344_v59 = vadd.f32 %v2343_v47, %v2217_v49  ;;  %3982 = vst [vmem:[%s4856_s22 + $0x60] sm:$0xff] %v3714_v51   ;;  %v2222_v29 = vmul.f32 %v4152_v54, %v4152_v54 }
 0x160   : > { %v1272_v62 = vpop.f32.mrf.mxu0  ;;  %4014 = vst [vmem:[%s4856_s22 + $0x160] sm:$0xff] %v3874_v28  }
 0x161   : > { %v2345_v1 = vadd.f32 %v2344_v59, %v2218_v57  ;;  %v2084_v3 = vadd.f32 %v4149_v35, %v2083_v58  ;;  %v2220_v8 = vmul.f32 %v1272_v62, %v1272_v62  ;;  %v4971_v35 = vpop.f32.mrf.mxu1 }
 0x162   : > { %v4153_v6 = vpop.f32.mrf.mxu0 }
 0x163   : > { %v2085_v7 = vadd.f32 %v2084_v3, %v1272_v62  ;;  %v2346_v11 = vadd.f32 %v2345_v1, %v2219_v0  ;;  %v3729_v12 = vpack.c.bf16 %v4153_v6, %v4152_v54  ;;  %v2223_v38 = vmul.f32 %v4153_v6, %v4153_v6  ;;  %v4974_v43 = vpop.f32.mrf.mxu1 }
 0x164   : > { %v1275_v14 = vpop.f32.mrf.mxu0 }
 0x165   : > { %v2347_v17 = vadd.f32 %v2346_v11, %v2220_v8  ;;  %3985 = vst [vmem:[%s4856_s22 + $0x78] sm:$0xff] %v3729_v12   ;;  %v2086_v19 = vadd.f32 %v2085_v7, %v1275_v14  ;;  %v2221_v20 = vmul.f32 %v1275_v14, %v1275_v14  ;;  %v3724_v22 = vpack.c.bf16 %v1275_v14, %v1272_v62 }
 0x166   : > { %v4156_v25 = vpop.f32.mrf.mxu0 }
 0x167   : > { %v2087_v30 = vadd.f32 %v4152_v54, %v2086_v19  ;;  %v2348_v33 = vadd.f32 %v2347_v17, %v2221_v20  ;;  %3984 = vst [vmem:[%s4856_s22 + $0x70] sm:$0xff] %v3724_v22   ;;  %v4976_v54 = vpop.f32.mrf.mxu1  ;;  %v2226_v7 = vmul.f32 %v4156_v25, %v4156_v25 }
 0x168   : > { %v1288_v36 = vpop.f32.mrf.mxu0  ;;  %v3889_v57 = vpack.c.bf16 %v4976_v54, %v4971_v35 }
 0x169   : > { %v2349_v40 = vadd.f32 %v2348_v33, %v2222_v29  ;;  %v2088_v41 = vadd.f32 %v4153_v6, %v2087_v30  ;;  %v2224_v48 = vmul.f32 %v1288_v36, %v1288_v36  ;;  %v4981_v1 = vpop.f32.mrf.mxu1 }
 0x16a   : > { %v4157_v46 = vpop.f32.mrf.mxu0  ;;  %4017 = vst [vmem:[%s4856_s22 + $0x178] sm:$0xff] %v3889_v57   ;;  %v3884_v6 = vpack.c.bf16 %v4981_v1, %v4974_v43 }
 0x16b   : > { %v2089_v47 = vadd.f32 %v2088_v41, %v1288_v36  ;;  %v2350_v49 = vadd.f32 %v2349_v40, %v2223_v38  ;;  %v3739_v51 = vpack.c.bf16 %v4157_v46, %v4156_v25  ;;  %v4987_v12 = vpop.f32.mrf.mxu1  ;;  %v2227_v15 = vmul.f32 %v4157_v46, %v4157_v46 }
 0x16c   : > { %v1291_v55 = vpop.f32.mrf.mxu0  ;;  %4016 = vst [vmem:[%s4856_s22 + $0x170] sm:$0xff] %v3884_v6  }
 0x16d   : > { %v2351_v58 = vadd.f32 %v2350_v49, %v2224_v48  ;;  %3987 = vst [vmem:[%s4856_s22 + $0x88] sm:$0xff] %v3739_v51   ;;  %v2090_v59 = vadd.f32 %v2089_v47, %v1291_v55  ;;  %v2225_v62 = vmul.f32 %v1291_v55, %v1291_v55  ;;  %v3734_v0 = vpack.c.bf16 %v1291_v55, %v1288_v36  ;;  %v4990_v20 = vpop.f32.mrf.mxu1 }
 0x16e   : > { %v4160_v3 = vpop.f32.mrf.mxu0 }
 0x16f   : > { %v2091_v8 = vadd.f32 %v4156_v25, %v2090_v59  ;;  %v2352_v11 = vadd.f32 %v2351_v58, %v2225_v62  ;;  %3986 = vst [vmem:[%s4856_s22 + $0x80] sm:$0xff] %v3734_v0   ;;  %v4992_v25 = vpop.f32.mrf.mxu1  ;;  %v2230_v55 = vmul.f32 %v4160_v3, %v4160_v3 }
 0x170   : > { %v1304_v14 = vpop.f32.mrf.mxu0  ;;  %v3899_v38 = vpack.c.bf16 %v4992_v25, %v4987_v12 }
 0x171   : > { %v2353_v17 = vadd.f32 %v2352_v11, %v2226_v7  ;;  %v2092_v19 = vadd.f32 %v4157_v46, %v2091_v8  ;;  %v2228_v29 = vmul.f32 %v1304_v14, %v1304_v14  ;;  %v4997_v48 = vpop.f32.mrf.mxu1 }
 0x172   : > { %v4161_v22 = vpop.f32.mrf.mxu0  ;;  %4019 = vst [vmem:[%s4856_s22 + $0x188] sm:$0xff] %v3899_v38   ;;  %v3894_v51 = vpack.c.bf16 %v4997_v48, %v4990_v20 }
 0x173   : > { %v2093_v28 = vadd.f32 %v2092_v19, %v1304_v14  ;;  %v2354_v30 = vadd.f32 %v2353_v17, %v2227_v15  ;;  %v3749_v33 = vpack.c.bf16 %v4161_v22, %v4160_v3  ;;  %v5003_v59 = vpop.f32.mrf.mxu1  ;;  %v2231_v0 = vmul.f32 %v4161_v22, %v4161_v22 }
 0x174   : > { %v1307_v36 = vpop.f32.mrf.mxu0  ;;  %4018 = vst [vmem:[%s4856_s22 + $0x180] sm:$0xff] %v3894_v51  }
 0x175   : > { %v2355_v40 = vadd.f32 %v2354_v30, %v2228_v29  ;;  %3989 = vst [vmem:[%s4856_s22 + $0x98] sm:$0xff] %v3749_v33   ;;  %v2094_v41 = vadd.f32 %v2093_v28, %v1307_v36  ;;  %v2229_v46 = vmul.f32 %v1307_v36, %v1307_v36  ;;  %v3744_v47 = vpack.c.bf16 %v1307_v36, %v1304_v14  ;;  %v5006_v8 = vpop.f32.mrf.mxu1 }
 0x176   : > { %v4164_v49 = vpop.f32.mrf.mxu0 }
 0x177   : > { %v2095_v57 = vadd.f32 %v4160_v3, %v2094_v41  ;;  %v2356_v58 = vadd.f32 %v2355_v40, %v2229_v46  ;;  %3988 = vst [vmem:[%s4856_s22 + $0x90] sm:$0xff] %v3744_v47   ;;  %v5008_v3 = vpop.f32.mrf.mxu1  ;;  %v2234_v46 = vmul.f32 %v4164_v49, %v4164_v49 }
 0x178   : > { %v1320_v62 = vpop.f32.mrf.mxu0  ;;  %v3909_v29 = vpack.c.bf16 %v5008_v3, %v5003_v59 }
 0x179   : > { %v2357_v6 = vadd.f32 %v2356_v58, %v2230_v55  ;;  %v2096_v7 = vadd.f32 %v4161_v22, %v2095_v57  ;;  %v2232_v15 = vmul.f32 %v1320_v62, %v1320_v62  ;;  %v5013_v38 = vpop.f32.mrf.mxu1 }
 0x17a   : > { %v4165_v11 = vpop.f32.mrf.mxu0  ;;  %4021 = vst [vmem:[%s4856_s22 + $0x198] sm:$0xff] %v3909_v29   ;;  %v3904_v41 = vpack.c.bf16 %v5013_v38, %v5006_v8 }
 0x17b   : > { %v2097_v14 = vadd.f32 %v2096_v7, %v1320_v62  ;;  %v2358_v17 = vadd.f32 %v2357_v6, %v2231_v0  ;;  %v3759_v19 = vpack.c.bf16 %v4165_v11, %v4164_v49  ;;  %v5019_v55 = vpop.f32.mrf.mxu1  ;;  %v2235_v58 = vmul.f32 %v4165_v11, %v4165_v11 }
 0x17c   : > { %v1323_v28 = vpop.f32.mrf.mxu0  ;;  %5482 = vst [vmem:[#allocation16_spill] sm:$0xff] %v5019_v55  ;;  %4020 = vst [vmem:[%s4856_s22 + $0x190] sm:$0xff] %v3904_v41  }
 0x17d   : > { %v2359_v30 = vadd.f32 %v2358_v17, %v2232_v15  ;;  %3991 = vst [vmem:[%s4856_s22 + $0xa8] sm:$0xff] %v3759_v19   ;;  %v2098_v33 = vadd.f32 %v2097_v14, %v1323_v28  ;;  %v2233_v22 = vmul.f32 %v1323_v28, %v1323_v28  ;;  %v3754_v36 = vpack.c.bf16 %v1323_v28, %v1320_v62  ;;  %v5022_v62 = vpop.f32.mrf.mxu1 }
 0x17e   : > { %v4168_v40 = vpop.f32.mrf.mxu0 }
 0x17f   : > { %v2099_v47 = vadd.f32 %v4164_v49, %v2098_v33  ;;  %v2360_v51 = vadd.f32 %v2359_v30, %v2233_v22  ;;  %3990 = vst [vmem:[%s4856_s22 + $0xa0] sm:$0xff] %v3754_v36   ;;  %v5024_v49 = vpop.f32.mrf.mxu1 }
 0x180   : > { %v1336_v57 = vpop.f32.mrf.mxu0  ;;  %5483 = vst [vmem:[#allocation17_spill] sm:$0xff] %v5024_v49  ;;  %v3919_v29 = vpack.c.bf16 %v5024_v49, %v5019_v55 }
 0x181   : > { %v2361_v0 = vadd.f32 %v2360_v51, %v2234_v46  ;;  %v2100_v6 = vadd.f32 %v4165_v11, %v2099_v47  ;;  %v2236_v15 = vmul.f32 %v1336_v57, %v1336_v57  ;;  %v5029_v36 = vpop.f32.mrf.mxu1  ;;  %v2238_v47 = vmul.f32 %v4168_v40, %v4168_v40 }
 0x182   : > { %v4169_v7 = vpop.f32.mrf.mxu0  ;;  %5484 = vst [vmem:[#allocation18_spill] sm:$0xff] %v5029_v36  ;;  %4023 = vst [vmem:[%s4856_s22 + $0x1a8] sm:$0xff] %v3919_v29   ;;  %v3914_v46 = vpack.c.bf16 %v5029_v36, %v5022_v62 }
 0x183   : > { %v2101_v14 = vadd.f32 %v2100_v6, %v1336_v57  ;;  %v2362_v17 = vadd.f32 %v2361_v0, %v2235_v58  ;;  %v3769_v19 = vpack.c.bf16 %v4169_v7, %v4168_v40  ;;  %v5035_v0 = vpop.f32.mrf.mxu1 }
 0x184   : > { %v1339_v28 = vpop.f32.mrf.mxu0  ;;  %5485 = vst [vmem:[#allocation19_spill] sm:$0xff] %v5035_v0  ;;  %4022 = vst [vmem:[%s4856_s22 + $0x1a0] sm:$0xff] %v3914_v46  }
 0x185   : > { %v2363_v30 = vadd.f32 %v2362_v17, %v2236_v15  ;;  %3993 = vst [vmem:[%s4856_s22 + $0xb8] sm:$0xff] %v3769_v19   ;;  %v2102_v33 = vadd.f32 %v2101_v14, %v1339_v28  ;;  %v2237_v11 = vmul.f32 %v1339_v28, %v1339_v28  ;;  %v3764_v22 = vpack.c.bf16 %v1339_v28, %v1336_v57  ;;  %v5038_v57 = vpop.f32.mrf.mxu1 }
 0x186   : > { %v4172_v41 = vpop.f32.mrf.mxu0  ;;  %v2239_v15 = vmul.f32 %v4169_v7, %v4169_v7  ;;  %5486 = vst [vmem:[#allocation20_spill] sm:$0xff] %v5038_v57 }
 0x187   : > { %v2103_v51 = vadd.f32 %v4168_v40, %v2102_v33  ;;  %v2364_v58 = vadd.f32 %v2363_v30, %v2237_v11  ;;  %3992 = vst [vmem:[%s4856_s22 + $0xb0] sm:$0xff] %v3764_v22   ;;  %v5040_v40 = vpop.f32.mrf.mxu1 }
 0x188   : > { %v1352_v6 = vpop.f32.mrf.mxu0  ;;  %5487 = vst [vmem:[#allocation21_spill] sm:$0xff] %v5040_v40  ;;  %v3929_v33 = vpack.c.bf16 %v5040_v40, %v5035_v0 }
 0x189   : > { %v2365_v14 = vadd.f32 %v2364_v58, %v2238_v47  ;;  %v2104_v17 = vadd.f32 %v4169_v7, %v2103_v51  ;;  %v2240_v29 = vmul.f32 %v1352_v6, %v1352_v6  ;;  %v5045_v47 = vpop.f32.mrf.mxu1 }
 0x18a   : > { %v4173_v19 = vpop.f32.mrf.mxu0  ;;  %5488 = vst [vmem:[#allocation22_spill] sm:$0xff] %v5045_v47  ;;  %4025 = vst [vmem:[%s4856_s22 + $0x1b8] sm:$0xff] %v3929_v33   ;;  %v3924_v58 = vpack.c.bf16 %v5045_v47, %v5038_v57 }
 0x18b   : > { %v2105_v28 = vadd.f32 %v2104_v17, %v1352_v6  ;;  %v2366_v49 = vadd.f32 %v2365_v14, %v2239_v15  ;;  %v3779_v55 = vpack.c.bf16 %v4173_v19, %v4172_v41  ;;  %v2242_v15 = vmul.f32 %v4172_v41, %v4172_v41  ;;  %v5051_v36 = vpop.f32.mrf.mxu1 }
 0x18c   : > { %v1355_v30 = vpop.f32.mrf.mxu0  ;;  %5489 = vst [vmem:[#allocation23_spill] sm:$0xff] %v5051_v36  ;;  %4024 = vst [vmem:[%s4856_s22 + $0x1b0] sm:$0xff] %v3924_v58  }
 0x18d   : > { %v2367_v11 = vadd.f32 %v2366_v49, %v2240_v29  ;;  %3995 = vst [vmem:[%s4856_s22 + $0xc8] sm:$0xff] %v3779_v55   ;;  %v2106_v22 = vadd.f32 %v2105_v28, %v1355_v30  ;;  %v2241_v7 = vmul.f32 %v1355_v30, %v1355_v30  ;;  %v3774_v46 = vpack.c.bf16 %v1355_v30, %v1352_v6  ;;  %v5054_v6 = vpop.f32.mrf.mxu1 }
 0x18e   : > { %v4176_v51 = vpop.f32.mrf.mxu0  ;;  %v2243_v55 = vmul.f32 %v4173_v19, %v4173_v19  ;;  %5490 = vst [vmem:[#allocation24_spill] sm:$0xff] %v5054_v6 }
 0x18f   : > { %v2107_v14 = vadd.f32 %v4172_v41, %v2106_v22  ;;  %v2368_v17 = vadd.f32 %v2367_v11, %v2241_v7  ;;  %3994 = vst [vmem:[%s4856_s22 + $0xc0] sm:$0xff] %v3774_v46   ;;  %v5056_v41 = vpop.f32.mrf.mxu1 }
 0x190   : > { %v1368_v40 = vpop.f32.mrf.mxu0  ;;  %5491 = vst [vmem:[#allocation25_spill] sm:$0xff] %v5056_v41  ;;  %v3939_v22 = vpack.c.bf16 %v5056_v41, %v5051_v36 }
 0x191   : > { %v2369_v49 = vadd.f32 %v2368_v17, %v2242_v15  ;;  %v2108_v28 = vadd.f32 %v4173_v19, %v2107_v14  ;;  %v2244_v33 = vmul.f32 %v1368_v40, %v1368_v40  ;;  %v5061_v15 = vpop.f32.mrf.mxu1 }
 0x192   : > { %v4177_v29 = vpop.f32.mrf.mxu0  ;;  %5492 = vst [vmem:[#allocation26_spill] sm:$0xff] %v5061_v15  ;;  %4027 = vst [vmem:[%s4856_s22 + $0x1c8] sm:$0xff] %v3939_v22   ;;  %v3934_v17 = vpack.c.bf16 %v5061_v15, %v5054_v6 }
 0x193   : > { %v2109_v30 = vadd.f32 %v2108_v28, %v1368_v40  ;;  %v2370_v0 = vadd.f32 %v2369_v49, %v2243_v55  ;;  %v3789_v47 = vpack.c.bf16 %v4177_v29, %v4176_v51  ;;  %v2246_v55 = vmul.f32 %v4176_v51, %v4176_v51  ;;  %v5067_v57 = vpop.f32.mrf.mxu1 }
 0x194   : > { %v1371_v11 = vpop.f32.mrf.mxu0  ;;  %5493 = vst [vmem:[#allocation27_spill] sm:$0xff] %v5067_v57  ;;  %4026 = vst [vmem:[%s4856_s22 + $0x1c0] sm:$0xff] %v3934_v17  }
 0x195   : > { %v2371_v7 = vadd.f32 %v2370_v0, %v2244_v33  ;;  %3997 = vst [vmem:[%s4856_s22 + $0xd8] sm:$0xff] %v3789_v47   ;;  %v2110_v46 = vadd.f32 %v2109_v30, %v1371_v11  ;;  %v2245_v19 = vmul.f32 %v1371_v11, %v1371_v11  ;;  %v3784_v58 = vpack.c.bf16 %v1371_v11, %v1368_v40  ;;  %v5070_v40 = vpop.f32.mrf.mxu1 }
 0x196   : > { %v4180_v14 = vpop.f32.mrf.mxu0  ;;  %v2247_v0 = vmul.f32 %v4177_v29, %v4177_v29 }
 0x197   : > { %v2111_v49 = vadd.f32 %v4176_v51, %v2110_v46  ;;  %v2372_v28 = vadd.f32 %v2371_v7, %v2245_v19  ;;  %3996 = vst [vmem:[%s4856_s22 + $0xd0] sm:$0xff] %v3784_v58   ;;  %v5072_v51 = vpop.f32.mrf.mxu1 }
 0x198   : > { %v1384_v41 = vpop.f32.mrf.mxu0  ;;  %5494 = vst [vmem:[#allocation28_spill] sm:$0xff] %v5072_v51  ;;  %v3949_v46 = vpack.c.bf16 %v5072_v51, %v5067_v57 }
 0x199   : > { %v2373_v47 = vadd.f32 %v2372_v28, %v2246_v55  ;;  %v2112_v30 = vadd.f32 %v4177_v29, %v2111_v49  ;;  %v2248_v22 = vmul.f32 %v1384_v41, %v1384_v41  ;;  %v5077_v55 = vpop.f32.mrf.mxu1 }
 0x19a   : > { %v4181_v33 = vpop.f32.mrf.mxu0  ;;  %5495 = vst [vmem:[#allocation29_spill] sm:$0xff] %v5077_v55  ;;  %4029 = vst [vmem:[%s4856_s22 + $0x1d8] sm:$0xff] %v3949_v46   ;;  %v3944_v28 = vpack.c.bf16 %v5077_v55, %v5070_v40 }
 0x19b   : > { %v2113_v11 = vadd.f32 %v2112_v30, %v1384_v41  ;;  %v2374_v36 = vadd.f32 %v2373_v47, %v2247_v0  ;;  %v3799_v15 = vpack.c.bf16 %v4181_v33, %v4180_v14  ;;  %v2250_v0 = vmul.f32 %v4180_v14, %v4180_v14  ;;  %v5083_v6 = vpop.f32.mrf.mxu1 }
 0x19c   : > { %v1387_v7 = vpop.f32.mrf.mxu0  ;;  %4028 = vst [vmem:[%s4856_s22 + $0x1d0] sm:$0xff] %v3944_v28  }
 0x19d   : > { %v2375_v19 = vadd.f32 %v2374_v36, %v2248_v22  ;;  %3999 = vst [vmem:[%s4856_s22 + $0xe8] sm:$0xff] %v3799_v15   ;;  %v2114_v58 = vadd.f32 %v2113_v11, %v1387_v7  ;;  %v2249_v29 = vmul.f32 %v1387_v7, %v1387_v7  ;;  %v3794_v17 = vpack.c.bf16 %v1387_v7, %v1384_v41  ;;  %v5086_v41 = vpop.f32.mrf.mxu1 }
 0x19e   : > { %v4184_v49 = vpop.f32.mrf.mxu0  ;;  %v2251_v36 = vmul.f32 %v4181_v33, %v4181_v33 }
 0x19f   : > { %v2115_v47 = vadd.f32 %v4180_v14, %v2114_v58  ;;  %v2376_v30 = vadd.f32 %v2375_v19, %v2249_v29  ;;  %3998 = vst [vmem:[%s4856_s22 + $0xe0] sm:$0xff] %v3794_v17   ;;  %v5088_v14 = vpop.f32.mrf.mxu1 }
 0x1a0   : > { %v1400_v51 = vpop.f32.mrf.mxu0  ;;  %5496 = vst [vmem:[#allocation30_spill] sm:$0xff] %v5088_v14  ;;  %v3959_v58 = vpack.c.bf16 %v5088_v14, %v5083_v6 }
 0x1a1   : > { %v2377_v15 = vadd.f32 %v2376_v30, %v2250_v0  ;;  %v2116_v11 = vadd.f32 %v4181_v33, %v2115_v47  ;;  %v2252_v46 = vmul.f32 %v1400_v51, %v1400_v51  ;;  %v5093_v0 = vpop.f32.mrf.mxu1  ;;  %v2254_v30 = vmul.f32 %v4184_v49, %v4184_v49 }
 0x1a2   : > { %v4185_v22 = vpop.f32.mrf.mxu0  ;;  %4031 = vst [vmem:[%s4856_s22 + $0x1e8] sm:$0xff] %v3959_v58   ;;  %v3954_v47 = vpack.c.bf16 %v5093_v0, %v5086_v41 }
 0x1a3   : > { %v2117_v7 = vadd.f32 %v2116_v11, %v1400_v51  ;;  %v2378_v57 = vadd.f32 %v2377_v15, %v2251_v36  ;;  %v3809_v55 = vpack.c.bf16 %v4185_v22, %v4184_v49  ;;  %v5099_v11 = vpop.f32.mrf.mxu1  ;;  %v2255_v14 = vmul.f32 %v4185_v22, %v4185_v22 }
 0x1a4   : > { %v1403_v19 = vpop.f32.mrf.mxu0  ;;  %4030 = vst [vmem:[%s4856_s22 + $0x1e0] sm:$0xff] %v3954_v47  }
 0x1a5   : > { %v2379_v29 = vadd.f32 %v2378_v57, %v2252_v46  ;;  %4001 = vst [vmem:[%s4856_s22 + $0xf8] sm:$0xff] %v3809_v55   ;;  %v2118_v17 = vadd.f32 %v2117_v7, %v1403_v19  ;;  %v2253_v33 = vmul.f32 %v1403_v19, %v1403_v19  ;;  %v3804_v28 = vpack.c.bf16 %v1403_v19, %v1400_v51  ;;  %v5102_v7 = vpop.f32.mrf.mxu1 }
 0x1a6   : > { %v2256_v51 = vmul.f32 %v4862_v26, %v4862_v26 }
 0x1a7   : > { %v2119_v36 = vadd.f32 %v4184_v49, %v2118_v17  ;;  %v2380_v15 = vadd.f32 %v2379_v29, %v2253_v33  ;;  %4000 = vst [vmem:[%s4856_s22 + $0xf0] sm:$0xff] %v3804_v28   ;;  %v5107_v58 = vpop.f32.mrf.mxu1 }
 0x1a8   : > { %v3969_v49 = vpack.c.bf16 %v5107_v58, %v5099_v11 }
 0x1a9   : > { %v2120_v57 = vadd.f32 %v4185_v22, %v2119_v36  ;;  %v2381_v55 = vadd.f32 %v2380_v15, %v2254_v30  ;;  %v2257_v22 = vmul.f32 %v4869_v39, %v4869_v39  ;;  %v5114_v33 = vpop.f32.mrf.mxu1  ;;  %v2259_v30 = vmul.f32 %v4864_v32, %v4864_v32 }
 0x1aa   : > { %4033 = vst [vmem:[%s4856_s22 + $0x1f8] sm:$0xff] %v3969_v49   ;;  %v3964_v28 = vpack.c.bf16 %v5114_v33, %v5102_v7 }
 0x1ab   : > { %v2121_v46 = vadd.f32 %v2120_v57, %v4862_v26  ;;  %v2382_v19 = vadd.f32 %v2381_v55, %v2255_v14  ;;  %v2258_v26 = vmul.f32 %v4860_v21, %v4860_v21  ;;  %v2260_v57 = vmul.f32 %v4878_v50, %v4878_v50 }
 0x1ac   : > { %4032 = vst [vmem:[%s4856_s22 + $0x1f0] sm:$0xff] %v3964_v28   ;;  %v2264_v28 = vmul.f32 %v4894_v10, %v4894_v10 }
 0x1ad   : > { %v2383_v29 = vadd.f32 %v2382_v19, %v2256_v51  ;;  %v2122_v17 = vadd.f32 %v2121_v46, %v4869_v39  ;;  %v2262_v19 = vmul.f32 %v4875_v45, %v4875_v45 }
 0x1af   : > { %v2123_v14 = vadd.f32 %v4860_v21, %v2122_v17  ;;  %v2384_v47 = vadd.f32 %v2383_v29, %v2257_v22  ;;  %v2261_v21 = vmul.f32 %v4885_v63, %v4885_v63  ;;  %v2263_v29 = vmul.f32 %v4880_v56, %v4880_v56 }
 0x1b1   : > { %v2385_v36 = vadd.f32 %v2384_v47, %v2258_v26  ;;  %v2124_v15 = vadd.f32 %v4864_v32, %v2123_v14  ;;  %v2265_v26 = vmul.f32 %v4901_v24, %v4901_v24 }
 0x1b3   : > { %v2125_v39 = vadd.f32 %v2124_v15, %v4878_v50  ;;  %v2386_v55 = vadd.f32 %v2385_v36, %v2259_v30 }
 0x1b5   : > { %v2387_v51 = vadd.f32 %v2386_v55, %v2260_v57  ;;  %v2126_v46 = vadd.f32 %v2125_v39, %v4885_v63 }
 0x1b7   : > { %v2127_v32 = vadd.f32 %v4875_v45, %v2126_v46  ;;  %v2388_v49 = vadd.f32 %v2387_v51, %v2261_v21 }
 0x1b9   : > { %v2389_v17 = vadd.f32 %v2388_v49, %v2262_v19  ;;  %v2128_v50 = vadd.f32 %v4880_v56, %v2127_v32 }
 0x1bb   : > { %v2129_v22 = vadd.f32 %v2128_v50, %v4894_v10  ;;  %v2390_v63 = vadd.f32 %v2389_v17, %v2263_v29 }
 0x1bd   : > { %v2391_v45 = vadd.f32 %v2390_v63, %v2264_v28  ;;  %v2130_v56 = vadd.f32 %v2129_v22, %v4901_v24 }
 0x1be   : > { %4492 = shalt.err (!%p4489_p2)
}
 0x1bf   : > { %s4493_s14 = scalar_lea.hbm %s5146_s7, 8192  ;;  %s4497_s30 = scalar_lea.hbm %s5431_s2, 16384 }
 0x1c0   : > { %p4494_p6 = scmp.ne.s32.totalorder %s5146_s7, %s4493_s14  ;;  %p4498_p11 = scmp.lt.s32.totalorder %s5146_s7, %s5431_s2 }
 0x1c1   : > { %p4499_p1 = scmp.lt.s32.totalorder %s4497_s30, %s4493_s14 }
 0x1c2   : > { %p4495_p9 = pnand %p4494_p6, %p4743_p0 }
 0x1c3   : > { %p4500_p8 = por %p4499_p1, %p4498_p11 }
 0x1c4   : > { %p4496_p13 = pneg %p4495_p9 }
 0x1c6   : > { %p4501_p4 = pnand %p4500_p8, %p4496_p13 }
 0x1c8   : > { %4504 = shalt.err (!%p4501_p4)
}
 0x1c9   : > { %s4626_s5 = smov 64   ;;  %s4627_s6 = smov 4   ;;  %v2266_v10 = vmul.f32 %v4891_v5, %v4891_v5  ;;  %v2131_v24 = vadd.f32 %v4891_v5, %v2130_v56  ;;  %v2392_v14 = vadd.f32 %v2391_v45, %v2265_v26  ;;  %v2267_v47 = vmul.f32 %v4896_v16, %v4896_v16 }
 0x1ca   : > { %4272 = dma.vmem_to_hbm [thread:$0]  (%p4743_p0), %s5148_s25, 8192, %s5146_s7, %s3095_s8, %s4626_s5, %s4626_s5, %s4627_s6   ;;  %v2268_v39 = vmul.f32 %v4910_v37, %v4910_v37  ;;  %v2269_v46 = vmul.f32 %v4917_v53, %v4917_v53  ;;  %v2270_v5 = vmul.f32 %v4907_v31, %v4907_v31  ;;  %v2272_v29 = vmul.f32 %v4926_v2, %v4926_v2 }
 0x1cb   : > { %v2393_v30 = vadd.f32 %v2392_v14, %v2266_v10  ;;  %v2132_v36 = vadd.f32 %v4896_v16, %v2131_v24  ;;  %v2271_v16 = vmul.f32 %v4912_v44, %v4912_v44  ;;  %v2273_v22 = vmul.f32 %v4933_v18, %v4933_v18  ;;  %s3099_s25 = sand.u32 1, %s4686_s21   ;;  %s3517_s7 = sshll.u32 %s4611_s18, 4 }
 0x1cc   : > { %v2276_v26 = vmul.f32 %v4942_v34, %v4942_v34  ;;  %v2277_v14 = vmul.f32 %v4949_v52, %v4949_v52  ;;  %s279_s8 = scalar_lea.vmem [#allocation9], %s4774_s13  ;;  %s285_s9 = scalar_lea.vmem [#allocation11], %s4774_s13 }
 0x1cd   : > { %v2133_v15 = vadd.f32 %v2132_v36, %v4910_v37  ;;  %v2394_v57 = vadd.f32 %v2393_v30, %v2267_v47  ;;  %s3134_s12 = sshll.u32 %s279_s8, 4  ;;  %s3148_s27 = sshll.u32 %s285_s9, 4  ;;  %s5349_s12 = int_to_ptr.vmem [resolvable:$true] %s3134_s12  ;;  %s5356_s27 = int_to_ptr.vmem [resolvable:$true] %s3148_s27 }
 0x1ce   : > { %s5347_s1 = scalar_lea.hbm %s5432_s3, %s3517_s7  ;;  %s5354_s28 = scalar_lea.hbm %s5433_s4, %s3517_s7 }
 0x1cf   : > { %v2395_v55 = vadd.f32 %v2394_v57, %v2268_v39  ;;  %v2134_v51 = vadd.f32 %v2133_v15, %v4917_v53  ;;  %v2280_v39 = vmul.f32 %v4958_v4, %v4958_v4  ;;  %s5358_s30 = scalar_lea.sflag [#allocation10], %s3099_s25  ;;  %s4505_s22 = scalar_lea.vmem %s5349_s12, 16 }
 0x1d0   : > { %p4506_p10 = scmp.ne.s32.totalorder %s5349_s12, %s4505_s22  ;;  %s4628_s23 = smov [#allocation9]  }
 0x1d1   : > { %v2135_v21 = vadd.f32 %v4907_v31, %v2134_v51  ;;  %v2396_v19 = vadd.f32 %v2395_v55, %v2269_v46  ;;  %v2274_v31 = vmul.f32 %v4923_v60, %v4923_v60  ;;  %v2281_v51 = vmul.f32 %v4965_v23, %v4965_v23  ;;  %s4509_s5 = sshll.u32 %s4628_s23, 4  ;;  %s4510_s5 = int_to_ptr.vmem [resolvable:$false] %s4509_s5 }
 0x1d2   : > { %p4507_p12 = pnand %p4506_p10, %p4743_p0  ;;  %s4511_s6 = scalar_lea.vmem %s4510_s5, 32 }
 0x1d3   : > { %v2397_v32 = vadd.f32 %v2396_v19, %v2270_v5  ;;  %v2136_v49 = vadd.f32 %v4912_v44, %v2135_v21  ;;  %v2275_v44 = vmul.f32 %v4928_v9, %v4928_v9  ;;  %p4512_p5 = scmp.lt.s32.totalorder %s5349_s12, %s4510_s5  ;;  %p4513_p7 = scmp.lt.s32.totalorder %s4511_s6, %s4505_s22 }
 0x1d4   : > { %p4508_p3 = pneg %p4507_p12 }
 0x1d5   : > { %v2137_v37 = vadd.f32 %v2136_v49, %v4926_v2  ;;  %v2398_v17 = vadd.f32 %v2397_v32, %v2271_v16  ;;  %v2284_v16 = vmul.f32 %v4974_v43, %v4974_v43  ;;  %p4514_p2 = por %p4513_p7, %p4512_p5 }
 0x1d7   : > { %v2399_v50 = vadd.f32 %v2398_v17, %v2272_v29  ;;  %v2138_v53 = vadd.f32 %v2137_v37, %v4933_v18  ;;  %v2285_v37 = vmul.f32 %v4981_v1, %v4981_v1  ;;  %p4515_p6 = pnand %p4514_p2, %p4508_p3 }
 0x1d9   : > { %v2139_v28 = vadd.f32 %v4923_v60, %v2138_v53  ;;  %v2400_v63 = vadd.f32 %v2399_v50, %v2273_v22  ;;  %v2278_v60 = vmul.f32 %v4939_v27, %v4939_v27  ;;  %v2288_v22 = vmul.f32 %v4990_v20, %v4990_v20 }
 0x1db   : > { %v2401_v45 = vadd.f32 %v2400_v63, %v2274_v31  ;;  %v2140_v56 = vadd.f32 %v4928_v9, %v2139_v28  ;;  %v2279_v9 = vmul.f32 %v4944_v42, %v4944_v42  ;;  %v2289_v63 = vmul.f32 %v4997_v48, %v4997_v48 }
 0x1dd   : > { %v2141_v2 = vadd.f32 %v2140_v56, %v4942_v34  ;;  %v2402_v10 = vadd.f32 %v2401_v45, %v2275_v44 }
 0x1df   : > { %v2403_v24 = vadd.f32 %v2402_v10, %v2276_v26  ;;  %v2142_v18 = vadd.f32 %v2141_v2, %v4949_v52  ;;  %v2292_v26 = vmul.f32 %v5006_v8, %v5006_v8 }
 0x1e1   : > { %v2143_v47 = vadd.f32 %v4939_v27, %v2142_v18  ;;  %v2404_v30 = vadd.f32 %v2403_v24, %v2277_v14  ;;  %v2282_v27 = vmul.f32 %v4955_v61, %v4955_v61  ;;  %v2293_v18 = vmul.f32 %v5013_v38, %v5013_v38 }
 0x1e3   : > { %v2405_v36 = vadd.f32 %v2404_v30, %v2278_v60  ;;  %v2144_v15 = vadd.f32 %v4944_v42, %v2143_v47  ;;  %v2283_v42 = vmul.f32 %v4960_v13, %v4960_v13 }
 0x1e5   : > { %v2145_v34 = vadd.f32 %v2144_v15, %v4958_v4  ;;  %v2406_v57 = vadd.f32 %v2405_v36, %v2279_v9  ;;  %v2296_v9 = vmul.f32 %v5022_v62, %v5022_v62 }
 0x1e7   : > { %v2407_v55 = vadd.f32 %v2406_v57, %v2280_v39  ;;  %v2146_v52 = vadd.f32 %v2145_v34, %v4965_v23 }
 0x1e9   : > { %v2147_v46 = vadd.f32 %v4955_v61, %v2146_v52  ;;  %v2408_v5 = vadd.f32 %v2407_v55, %v2281_v51  ;;  %v2286_v61 = vmul.f32 %v4971_v35, %v4971_v35  ;;  %v5499_v51 = vld [vmem:[#allocation17_spill] sm:$0xff] }
 0x1eb   : > { %v2409_v21 = vadd.f32 %v2408_v5, %v2282_v27  ;;  %v2148_v19 = vadd.f32 %v4960_v13, %v2147_v46  ;;  %v2287_v13 = vmul.f32 %v4976_v54, %v4976_v54 }
 0x1ed   : > { %v2149_v4 = vadd.f32 %v2148_v19, %v4974_v43  ;;  %v2410_v32 = vadd.f32 %v2409_v21, %v2283_v42 }
 0x1ef   : > { %v2411_v49 = vadd.f32 %v2410_v32, %v2284_v16  ;;  %v2150_v23 = vadd.f32 %v2149_v4, %v4981_v1  ;;  %v5501_v4 = vld [vmem:[#allocation22_spill] sm:$0xff] }
 0x1f0   : > { %v2301_v32 = vmul.f32 %v5501_v4, %v5501_v4 }
 0x1f1   : > { %v2151_v29 = vadd.f32 %v4971_v35, %v2150_v23  ;;  %v2412_v17 = vadd.f32 %v2411_v49, %v2285_v37  ;;  %v2290_v35 = vmul.f32 %v4987_v12, %v4987_v12  ;;  %v5502_v49 = vld [vmem:[#allocation19_spill] sm:$0xff] }
 0x1f2   : > { %v2302_v23 = vmul.f32 %v5502_v49, %v5502_v49 }
 0x1f3   : > { %v2413_v50 = vadd.f32 %v2412_v17, %v2286_v61  ;;  %v2152_v53 = vadd.f32 %v4976_v54, %v2151_v29  ;;  %v2291_v54 = vmul.f32 %v4992_v25, %v4992_v25  ;;  %v5503_v29 = vld [vmem:[#allocation21_spill] sm:$0xff] }
 0x1f4   : > { %v2303_v17 = vmul.f32 %v5503_v29, %v5503_v29 }
 0x1f5   : > { %v2153_v43 = vadd.f32 %v2152_v53, %v4990_v20  ;;  %v2414_v31 = vadd.f32 %v2413_v50, %v2287_v13  ;;  %v5504_v53 = vld [vmem:[#allocation24_spill] sm:$0xff] }
 0x1f7   : > { %v2415_v28 = vadd.f32 %v2414_v31, %v2288_v22  ;;  %v2154_v1 = vadd.f32 %v2153_v43, %v4997_v48  ;;  %v2304_v22 = vmul.f32 %v5504_v53, %v5504_v53 }
 0x1f9   : > { %v2155_v44 = vadd.f32 %v4987_v12, %v2154_v1  ;;  %v2416_v45 = vadd.f32 %v2415_v28, %v2289_v63  ;;  %v2294_v12 = vmul.f32 %v5003_v59, %v5003_v59  ;;  %v5505_v1 = vld [vmem:[#allocation26_spill] sm:$0xff] }
 0x1fb   : > { %v2417_v56 = vadd.f32 %v2416_v45, %v2290_v35  ;;  %v2156_v2 = vadd.f32 %v4992_v25, %v2155_v44  ;;  %v2295_v25 = vmul.f32 %v5008_v3, %v5008_v3  ;;  %v2305_v35 = vmul.f32 %v5505_v1, %v5505_v1  ;;  %v5506_v44 = vld [vmem:[#allocation23_spill] sm:$0xff] }
 0x1fc   : > { %v2306_v45 = vmul.f32 %v5506_v44, %v5506_v44 }
 0x1fd   : > { %v2157_v20 = vadd.f32 %v2156_v2, %v5006_v8  ;;  %v2418_v10 = vadd.f32 %v2417_v56, %v2291_v54  ;;  %v5507_v2 = vld [vmem:[#allocation25_spill] sm:$0xff] }
 0x1ff   : > { %v2419_v24 = vadd.f32 %v2418_v10, %v2292_v26  ;;  %v2158_v48 = vadd.f32 %v2157_v20, %v5013_v38  ;;  %v5497_v38 = vld [vmem:[#allocation18_spill] sm:$0xff]  ;;  %v2307_v20 = vmul.f32 %v5507_v2, %v5507_v2 }
 0x200   : > { %v2297_v39 = vmul.f32 %v5497_v38, %v5497_v38 }
 0x201   : > { %v2159_v14 = vadd.f32 %v5003_v59, %v2158_v48  ;;  %v2420_v60 = vadd.f32 %v2419_v24, %v2293_v18  ;;  %v5498_v59 = vld [vmem:[#allocation16_spill] sm:$0xff]  ;;  %v2308_v48 = vmul.f32 %v5070_v40, %v5070_v40 }
 0x202   : > { %v2298_v57 = vmul.f32 %v5498_v59, %v5498_v59 }
 0x203   : > { %v2421_v47 = vadd.f32 %v2420_v60, %v2294_v12  ;;  %v2160_v30 = vadd.f32 %v5008_v3, %v2159_v14  ;;  %v2299_v3 = vmul.f32 %v5499_v51, %v5499_v51  ;;  %v5508_v14 = vld [vmem:[#allocation29_spill] sm:$0xff] }
 0x205   : > { %v2161_v8 = vadd.f32 %v2160_v30, %v5022_v62  ;;  %v2422_v36 = vadd.f32 %v2421_v47, %v2295_v25  ;;  %v5500_v62 = vld [vmem:[#allocation20_spill] sm:$0xff]  ;;  %v2309_v25 = vmul.f32 %v5508_v14, %v5508_v14  ;;  %v5509_v47 = vld [vmem:[#allocation27_spill] sm:$0xff] }
 0x206   : > { %v2300_v42 = vmul.f32 %v5500_v62, %v5500_v62  ;;  %v2310_v30 = vmul.f32 %v5509_v47, %v5509_v47 }
 0x207   : > { %v2423_v15 = vadd.f32 %v2422_v36, %v2296_v9  ;;  %v2162_v34 = vadd.f32 %v2161_v8, %v5497_v38  ;;  %v5510_v36 = vld [vmem:[#allocation28_spill] sm:$0xff] }
 0x209   : > { %v2163_v55 = vadd.f32 %v5498_v59, %v2162_v34  ;;  %v2424_v52 = vadd.f32 %v2423_v15, %v2297_v39  ;;  %v2311_v15 = vmul.f32 %v5510_v36, %v5510_v36  ;;  %v2312_v39 = vmul.f32 %v5086_v41, %v5086_v41 }
 0x20b   : > { %v2425_v27 = vadd.f32 %v2424_v52, %v2298_v57  ;;  %v2164_v46 = vadd.f32 %v5499_v51, %v2163_v55  ;;  %v2313_v52 = vmul.f32 %v5093_v0, %v5093_v0  ;;  %v2314_v51 = vmul.f32 %v5083_v6, %v5083_v6 }
 0x20d   : > { %v2165_v5 = vadd.f32 %v2164_v46, %v5500_v62  ;;  %v2426_v21 = vadd.f32 %v2425_v27, %v2299_v3  ;;  %v5511_v46 = vld [vmem:[#allocation30_spill] sm:$0xff] }
 0x20e   : > { %v2315_v62 = vmul.f32 %v5511_v46, %v5511_v46 }
 0x20f   : > { %v2427_v19 = vadd.f32 %v2426_v21, %v2300_v42  ;;  %v2166_v16 = vadd.f32 %v2165_v5, %v5501_v4  ;;  %v2316_v21 = vmul.f32 %v5102_v7, %v5102_v7 }
 0x211   : > { %v2167_v37 = vadd.f32 %v5502_v49, %v2166_v16  ;;  %v2428_v61 = vadd.f32 %v2427_v19, %v2301_v32  ;;  %v2318_v16 = vmul.f32 %v5099_v11, %v5099_v11 }
 0x213   : > { %v2429_v13 = vadd.f32 %v2428_v61, %v2302_v23  ;;  %v2168_v50 = vadd.f32 %v5503_v29, %v2167_v37  ;;  %v2319_v23 = vmul.f32 %v5107_v58, %v5107_v58 }
 0x215   : > { %v2169_v43 = vadd.f32 %v2168_v50, %v5504_v53  ;;  %v2430_v31 = vadd.f32 %v2429_v13, %v2303_v17 }
 0x217   : > { %v2431_v28 = vadd.f32 %v2430_v31, %v2304_v22  ;;  %v2170_v63 = vadd.f32 %v2169_v43, %v5505_v1 }
 0x219   : > { %v2171_v54 = vadd.f32 %v5506_v44, %v2170_v63  ;;  %v2432_v56 = vadd.f32 %v2431_v28, %v2305_v35 }
 0x21b   : > { %v2433_v26 = vadd.f32 %v2432_v56, %v2306_v45  ;;  %v2172_v10 = vadd.f32 %v5507_v2, %v2171_v54 }
 0x21d   : > { %v2173_v24 = vadd.f32 %v2172_v10, %v5070_v40  ;;  %v2434_v18 = vadd.f32 %v2433_v26, %v2307_v20 }
 0x21f   : > { %v2435_v12 = vadd.f32 %v2434_v18, %v2308_v48  ;;  %v2174_v60 = vadd.f32 %v2173_v24, %v5508_v14 }
 0x221   : > { %v2175_v8 = vadd.f32 %v5509_v47, %v2174_v60  ;;  %v2436_v9 = vadd.f32 %v2435_v12, %v2309_v25 }
 0x223   : > { %v2437_v38 = vadd.f32 %v2436_v9, %v2310_v30  ;;  %v2176_v34 = vadd.f32 %v5510_v36, %v2175_v8 }
 0x225   : > { %v2177_v40 = vadd.f32 %v2176_v34, %v5086_v41  ;;  %v2438_v59 = vadd.f32 %v2437_v38, %v2311_v15 }
 0x227   : > { %v2439_v57 = vadd.f32 %v2438_v59, %v2312_v39  ;;  %v2178_v55 = vadd.f32 %v2177_v40, %v5093_v0 }
 0x229   : > { %v2179_v3 = vadd.f32 %v5083_v6, %v2178_v55  ;;  %v2440_v27 = vadd.f32 %v2439_v57, %v2313_v52  ;;  %v2317_v6 = vmul.f32 %v5114_v33, %v5114_v33 }
 0x22b   : > { %v2441_v5 = vadd.f32 %v2440_v27, %v2314_v51  ;;  %v2180_v42 = vadd.f32 %v5511_v46, %v2179_v3 }
 0x22d   : > { %v2181_v41 = vadd.f32 %v2180_v42, %v5102_v7  ;;  %v2442_v19 = vadd.f32 %v2441_v5, %v2315_v62 }
 0x22f   : > { %v2443_v4 = vadd.f32 %v2442_v19, %v2316_v21  ;;  %v2182_v0 = vadd.f32 %v2181_v41, %v5114_v33 }
 0x231   : > { %v2183_v32 = vadd.f32 %v5099_v11, %v2182_v0  ;;  %v2444_v49 = vadd.f32 %v2443_v4, %v2317_v6 }
 0x233   : > { %v2184_v7 = vadd.f32 %v5107_v58, %v2183_v32  ;;  %v2445_v37 = vadd.f32 %v2444_v49, %v2318_v16 }
 0x235   : > { %v2185_v61 = vrot.slane %v2184_v7, 4  ;;  %v2446_v29 = vadd.f32 %v2445_v37, %v2319_v23 }
 0x237   : > { %v2186_v17 = vadd.f32 %v2185_v61, %v2184_v7  ;;  %v2447_v33 = vrot.slane %v2446_v29, 4 }
 0x239   : > { %v2187_v13 = vrot.slane %v2186_v17, 2  ;;  %v2448_v50 = vadd.f32 %v2447_v33, %v2446_v29 }
 0x23b   : > { %v2188_v53 = vadd.f32 %v2187_v13, %v2186_v17  ;;  %v2449_v43 = vrot.slane %v2448_v50, 2 }
 0x23d   : > { %v2189_v11 = vrot.slane %v2188_v53, 1  ;;  %v2450_v22 = vadd.f32 %v2449_v43, %v2448_v50 }
 0x23f   : > { %v2451_v58 = vrot.slane %v2450_v22, 1  ;;  %v2190_v31 = vadd.f32 %v2189_v11, %v2188_v53 }
 0x241   : > { %2191 = vst [vmem:[%s279_s8] sm:$0x1] %v2190_v31  ;;  %v2452_v28 = vadd.f32 %v2451_v58, %v2450_v22 }
 0x242   : > { %4518 = shalt.err (!%p4515_p6)
}
 0x243   : > { %s4519_s25 = scalar_lea.hbm %s5347_s1, 16  ;;  %s4523_s10 = scalar_lea.hbm %s5432_s3, 32 }
 0x244   : > { %p4520_p9 = scmp.ne.s32.totalorder %s5347_s1, %s4519_s25  ;;  %p4524_p1 = scmp.lt.s32.totalorder %s5347_s1, %s5432_s3 }
 0x245   : > { %p4525_p8 = scmp.lt.s32.totalorder %s4523_s10, %s4519_s25 }
 0x246   : > { %p4521_p13 = pnand %p4520_p9, %p4743_p0 }
 0x247   : > { %p4526_p4 = por %p4525_p8, %p4524_p1 }
 0x248   : > { %p4522_p11 = pneg %p4521_p13 }
 0x24a   : > { %p4527_p10 = pnand %p4526_p4, %p4522_p11 }
 0x24c   : > { %4530 = shalt.err (!%p4527_p10)
}
 0x24d   : > { %4273 = dma.vmem_to_hbm [thread:$0]  (%p4743_p0), %s5349_s12, 16, %s5347_s1, %s5358_s30   ;;  %2453 = vst [vmem:[%s285_s9] sm:$0x1] %v2452_v28 }
 0x24e   : > { %s4531_s21 = scalar_lea.vmem %s5356_s27, 16  ;;  %s4629_s22 = smov [#allocation11]  }
 0x24f   : > { %p4532_p12 = scmp.ne.s32.totalorder %s5356_s27, %s4531_s21  ;;  %s4535_s23 = sshll.u32 %s4629_s22, 4  ;;  %s4536_s23 = int_to_ptr.vmem [resolvable:$false] %s4535_s23 }
 0x250   : > { %s4537_s5 = scalar_lea.vmem %s4536_s23, 32  ;;  %p4538_p7 = scmp.lt.s32.totalorder %s5356_s27, %s4536_s23 }
 0x251   : > { %p4533_p3 = pnand %p4532_p12, %p4743_p0  ;;  %p4539_p2 = scmp.lt.s32.totalorder %s4537_s5, %s4531_s21 }
 0x253   : > { %p4534_p5 = pneg %p4533_p3  ;;  %p4540_p6 = por %p4539_p2, %p4538_p7 }
 0x255   : > { %p4541_p9 = pnand %p4540_p6, %p4534_p5 }
 0x257   : > { %4544 = shalt.err (!%p4541_p9)
}
 0x258   : > { %s4545_s13 = scalar_lea.hbm %s5354_s28, 16  ;;  %s4549_s1 = scalar_lea.hbm %s5433_s4, 32 }
 0x259   : > { %p4546_p13 = scmp.ne.s32.totalorder %s5354_s28, %s4545_s13  ;;  %p4550_p8 = scmp.lt.s32.totalorder %s5354_s28, %s5433_s4 }
 0x25a   : > { %p4551_p4 = scmp.lt.s32.totalorder %s4549_s1, %s4545_s13 }
 0x25b   : > { %p4547_p11 = pnand %p4546_p13, %p4743_p0 }
 0x25c   : > { %p4552_p10 = por %p4551_p4, %p4550_p8 }
 0x25d   : > { %p4548_p1 = pneg %p4547_p11 }
 0x25f   : > { %p4553_p12 = pnand %p4552_p10, %p4548_p1 }
 0x261   : > { %4556 = shalt.err (!%p4553_p12)
}
 0x262   : > { %4274 = dma.vmem_to_hbm [thread:$0]  (%p4743_p0), %s5356_s27, 16, %s5354_s28, %s5358_s30  }
 0x263 PF: > { %s3160_s7 = sand.u32 1, %s4599_s15   ;;  %p5512_p3 = scmp.ne.s32.totalorder %s5470_s24, 0 }
 0x264   : > { %p5513_p5 = scmp.ge.s32.totalorder %s4619_s20, 2  ;;  %s3161_s8 = scalar_lea.sflag [#allocation5], %s3160_s7 }
 0x266   : > { %p4287_p7 = pnand %p5513_p5, %p5512_p3 }
 0x268   : > { %p4288_p2 = pneg %p4287_p7 }
 0x26a   : > { %4590 = dma.done.wait (%p4288_p2), %s3161_s8, 8192  }
 0x26b   : > { %4592 = vsyncadd (%p4288_p2), %s3161_s8, 4294959104  ;;  %s5514_s10 = sadd.s32 4294967294, %s4619_s20  }
 0x26c   : > { %s3169_s14 = sand.u32 1, %s5514_s10  }
 0x26d   : > { %s3170_s11 = scalar_lea.sflag [#allocation10], %s3169_s14 }
 0x26e   : > { %4594 = dma.done.wait (%p4288_p2), %s3170_s11, 32  }
 0x26f   : > { %4596 = vsyncadd (%p4288_p2), %s3170_s11, 4294967264  ;;  %s25_s20 = sadd.s32 1, %s4619_s20   ;;  %s5515_s15 = smov %s4603_s16 }
 0x270   : > { %p22_p0 = scmp.ge.s32.totalorder %s25_s20, 4   ;;  %s5516_s16 = smov %s4607_s17 }
 0x271   : > { %s5517_s17 = smov %s4752_s26  ;;  %s5518_s18 = smov %s4615_s19 }
 0x272   : > { %s5519_s19 = smov %s5521_s29  ;;  %24 = sbr.rel (!%p22_p0) target bundleno = 11 (0xb), region = 118 }
 0x277   :  { %3182 = vsyncpa [#allocation4], 1 }
 0x278   :  { %3184 = vsyncpa [#allocation4 + $0x1], 1 }
 0x279   :  { %3185 = vsyncpa [#allocation7], 1 }
 0x27a   :  { %3186 = vsyncpa [#allocation5], 1 }
 0x27b   :  { %3188 = vsyncpa [#allocation5 + $0x1], 1 }
 0x27c   :  { %3189 = vsyncpa [#allocation10], 1 }
 0x27d   :  { %3191 = vsyncpa [#allocation10 + $0x1], 1 }

</bundles_post_ra>
